<compile_context>
chip_gen: v7x
topology: tpu7x:2x2x1
jax: 0.10.0
libtpu: 0.0.40
codegen_flags: <defaults>
</compile_context>

<pallas_src>
import functools

import jax
import jax.numpy as jnp
from jax.experimental import pallas as pl
from jax.experimental.pallas import tpu as pltpu

BN_EPS = 1e-5


def _round_up(x, m):
    return (x + m - 1) // m * m


_VMEM_LIMIT = None


def _vmem_limit_bytes():
    """Generation-aware VMEM budget: ~half of physical VMEM, capped.
    v5e/v6e (128 MiB physical) -> 64 MiB; v7x (64 MiB physical) -> 32 MiB."""
    global _VMEM_LIMIT
    if _VMEM_LIMIT is None:
        try:
            cap = pltpu.get_tpu_info().vmem_capacity_bytes
            _VMEM_LIMIT = int(min(cap // 2, 96 * 1024 * 1024))
        except Exception:  # pragma: no cover - conservative fallback
            _VMEM_LIMIT = 32 * 1024 * 1024
    return _VMEM_LIMIT


def _conv_vmem_est(tm, tk, tn):
    """Rough working-set estimate for one conv grid step (double-buffered I/O)."""
    a = tm * tk * 2            # bf16 patches tile
    b = tk * tn * 2            # bf16 weight tile
    y = tm * tn * 2            # bf16 conv-output tile
    stats = 2 * tn * 4         # per-tile channel sums
    acc = tm * tn * 4          # f32 accumulator scratch
    return 2 * (a + b + y + stats) + acc


def _pick_tm(M):
    """Pick an M tile that divides M (no patches-row padding) when possible."""
    if M % 8 == 0 and M <= 512:
        return M, M
    for cand in (512, 384, 256, 128):
        if M % cand == 0:
            return cand, M
    tm = 256
    return tm, _round_up(M, tm)     # rare-shape fallback (pads the patches rows)


def _pick_tn(Cp):
    # Full output-channel width when it fits one tile: the patches matrix then
    # streams from HBM exactly once (nn == 1) and MXU pushes are full width.
    if Cp <= 512:
        return Cp
    return 256 if Cp % 256 == 0 else 128


def _plan(M, ksize, cin, cout):
    """Returns (tm, Mp, tn, Cp, cin_pad, K, tk).

    K-tiling preference: (a) the whole (unpadded) reduction as one block that equals
    the full dim -- no padding at all; (b) otherwise pad input channels to 128 once
    and use whole-tap multiples of the padded channel count as K tiles (tap-wise
    reduction axis). TODO(synk): allow tm=1024 on 128-MiB-VMEM parts for long K."""
    Cp = _round_up(cout, 128)
    tn = _pick_tn(Cp)
    tm, Mp = _pick_tm(M)
    nn = Cp // tn
    # Megacore: if the parallel grid would be a single tile, split it so both v7x
    # TensorCores get work (cheap: only fires on small layers).
    if Mp // tm == 1 and nn == 1 and tm >= 256 and tm % 16 == 0:
        tm //= 2
    budget = int(0.7 * _vmem_limit_bytes())
    K_raw = ksize * ksize * cin
    if _conv_vmem_est(tm, K_raw, tn) <= budget:
        return tm, Mp, tn, Cp, cin, K_raw, K_raw
    cin_p = _round_up(cin, 128)
    K = ksize * ksize * cin_p
    tk = cin_p
    for taps in range(ksize * ksize, 0, -1):
        cand = taps * cin_p
        if K % cand == 0 and _conv_vmem_est(tm, cand, tn) <= budget:
            tk = cand
            break
    return tm, Mp, tn, Cp, cin_p, K, tk


# --------------------------------------------------------------------------- #
# Pass 1: tiled im2col-matmul conv (bf16 MXU, f32 accum) + per-tile BN stats
# --------------------------------------------------------------------------- #
def _conv_stats_kernel(p_ref, w_ref, y_ref, s_ref, ss_ref, acc_ref):
    k = pl.program_id(2)

    @pl.when(k == 0)
    def _():
        acc_ref[...] = jnp.zeros_like(acc_ref)

    acc_ref[...] += jnp.dot(p_ref[...], w_ref[...],
                            preferred_element_type=jnp.float32)

    @pl.when(k == pl.num_programs(2) - 1)
    def _():
        acc = acc_ref[...]
        y_ref[...] = acc.astype(y_ref.dtype)
        # per-(M,N)-tile partial sums for *global* BN batch statistics
        # (when nk == 1 this epilogue is exposed rather than hidden under the
        #  K loop -- acceptable, it is a handful of VPU/XLU ops per tile)
        s_ref[...] = jnp.sum(acc, axis=0, keepdims=True)[None]
        ss_ref[...] = jnp.sum(acc * acc, axis=0, keepdims=True)[None]


def _conv_pass(patches_p, w_p, tm, tk, tn):
    Mp, K = patches_p.shape
    _, Cp = w_p.shape
    nm, nn, nk = Mp // tm, Cp // tn, K // tk

    flops = 2 * Mp * K * Cp
    bytes_accessed = int(Mp * K * 2 * nn + K * Cp * 2 * nm
                         + Mp * Cp * 2 + 2 * nm * Cp * 4)

    return pl.pallas_call(
        _conv_stats_kernel,
        out_shape=(
            jax.ShapeDtypeStruct((Mp, Cp), jnp.bfloat16),
            jax.ShapeDtypeStruct((nm, 1, Cp), jnp.float32),
            jax.ShapeDtypeStruct((nm, 1, Cp), jnp.float32),
        ),
        grid_spec=pltpu.PrefetchScalarGridSpec(
            num_scalar_prefetch=0,
            grid=(nm, nn, nk),
            in_specs=[
                pl.BlockSpec((tm, tk), lambda m, n, k: (m, k)),
                pl.BlockSpec((tk, tn), lambda m, n, k: (k, n)),
            ],
            out_specs=[
                pl.BlockSpec((tm, tn), lambda m, n, k: (m, n)),
                pl.BlockSpec((1, 1, tn), lambda m, n, k: (m, 0, n)),
                pl.BlockSpec((1, 1, tn), lambda m, n, k: (m, 0, n)),
            ],
            scratch_shapes=[pltpu.VMEM((tm, tn), jnp.float32)],
        ),
        compiler_params=pltpu.CompilerParams(
            dimension_semantics=("parallel", "parallel", "arbitrary"),
            vmem_limit_bytes=_vmem_limit_bytes(),
        ),
        cost_estimate=pl.CostEstimate(flops=flops, transcendentals=0,
                                      bytes_accessed=bytes_accessed),
    )(patches_p, w_p)


# --------------------------------------------------------------------------- #
# Pass 2: fused BN fold + normalize (single FMA) [+ residual] [+ ReLU]
# --------------------------------------------------------------------------- #
def _bn_act_kernel(y_ref, mu_ref, ms_ref, g_ref, b_ref, *rest,
                   relu, has_residual):
    o_ref = rest[-1]
    mean = mu_ref[...]
    var = jnp.maximum(ms_ref[...] - mean * mean, 0.0)
    scale = g_ref[...] * jax.lax.rsqrt(var + BN_EPS)   # EUP slot: effectively free
    shift = b_ref[...] - mean * scale
    y = y_ref[...].astype(jnp.float32) * scale + shift
    if has_residual:
        y = y + rest[0][...].astype(jnp.float32)
    if relu:
        y = jnp.maximum(y, 0.0)
    o_ref[...] = y.astype(o_ref.dtype)


def _bn_act_pass(y_p, mean, meansq, gamma_p, beta_p, residual_p, relu,
                 tm, tn, out_dtype):
    Mp, Cp = y_p.shape
    nm, nn = Mp // tm, Cp // tn

    args = [y_p, mean, meansq, gamma_p, beta_p]
    vec_spec = pl.BlockSpec((1, tn), lambda m, n: (0, n))
    in_specs = [pl.BlockSpec((tm, tn), lambda m, n: (m, n)),
                vec_spec, vec_spec, vec_spec, vec_spec]
    if residual_p is not None:
        args.append(residual_p)
        in_specs.append(pl.BlockSpec((tm, tn), lambda m, n: (m, n)))

    kernel = functools.partial(_bn_act_kernel, relu=relu,
                               has_residual=residual_p is not None)
    res_bytes = 0 if residual_p is None else Mp * Cp * residual_p.dtype.itemsize
    bytes_accessed = int(Mp * Cp * y_p.dtype.itemsize
                         + Mp * Cp * jnp.dtype(out_dtype).itemsize
                         + res_bytes + 4 * Cp * 4)

    return pl.pallas_call(
        kernel,
        out_shape=jax.ShapeDtypeStruct((Mp, Cp), out_dtype),
        grid_spec=pltpu.PrefetchScalarGridSpec(
            num_scalar_prefetch=0,
            grid=(nm, nn),
            in_specs=in_specs,
            out_specs=pl.BlockSpec((tm, tn), lambda m, n: (m, n)),
        ),
        compiler_params=pltpu.CompilerParams(
            dimension_semantics=("parallel", "parallel"),
            vmem_limit_bytes=_vmem_limit_bytes(),
        ),
        cost_estimate=pl.CostEstimate(flops=6 * Mp * Cp, transcendentals=Cp,
                                      bytes_accessed=bytes_accessed),
    )(*args)


# --------------------------------------------------------------------------- #
# Glue: im2col patch extraction (slices/concat/reshape only; all math in kernels)
# --------------------------------------------------------------------------- #
def _im2col(x_nhwc, ksize, stride, padding):
    if padding > 0:
        x_nhwc = jnp.pad(x_nhwc, ((0, 0), (padding, padding),
                                  (padding, padding), (0, 0)))
    B, Hp, Wp, C = x_nhwc.shape
    Ho = (Hp - ksize) // stride + 1
    Wo = (Wp - ksize) // stride + 1
    if ksize == 1 and stride == 1:
        patches = x_nhwc
    else:
        cols = []
        for kh in range(ksize):
            for kw in range(ksize):
                patch = jax.lax.slice(
                    x_nhwc,
                    (0, kh, kw, 0),
                    (B, kh + stride * (Ho - 1) + 1,
                     kw + stride * (Wo - 1) + 1, C),
                    (1, stride, stride, 1))
                cols.append(patch)
        patches = cols[0] if len(cols) == 1 else jnp.concatenate(cols, axis=-1)
    return patches.reshape(B * Ho * Wo, ksize * ksize * C), Ho, Wo


def fused_conv_bn_act(x_nhwc, w_hwio, gamma, beta, *, stride, padding, relu,
                      residual_pad=None, out_dtype=jnp.float32):
    """conv(k x k, stride) [bias-free: it cancels under BN(train)] -> BN(train)
    [+ residual] [+ ReLU].  Returns the padded (Mp, Cp) result plus geometry."""
    ksize, _, cin, cout = w_hwio.shape
    B, H, W, _ = x_nhwc.shape
    Ho = (H + 2 * padding - ksize) // stride + 1
    Wo = (W + 2 * padding - ksize) // stride + 1
    M = B * Ho * Wo

    tm, Mp, tn, Cp, cin_p, K, tk = _plan(M, ksize, cin, cout)

    # bf16 MXU inputs (f32 accumulation inside the kernel); channel padding only
    # when the K-tiling plan needs 128-multiple channels (input-sized copy).
    x_bf16 = x_nhwc.astype(jnp.bfloat16)
    if cin_p != cin:
        x_bf16 = jnp.pad(x_bf16, ((0, 0), (0, 0), (0, 0), (0, cin_p - cin)))
    patches, Ho2, Wo2 = _im2col(x_bf16, ksize, stride, padding)
    assert (Ho2, Wo2) == (Ho, Wo) and patches.shape == (M, K)
    if Mp != M:                         # rare fallback; usually a no-op
        patches = jnp.pad(patches, ((0, Mp - M), (0, 0)))

    w = w_hwio.astype(jnp.bfloat16)
    if cin_p != cin:
        w = jnp.pad(w, ((0, 0), (0, 0), (0, cin_p - cin), (0, 0)))
    w_p = w.reshape(K, cout)
    if Cp != cout:
        w_p = jnp.pad(w_p, ((0, 0), (0, Cp - cout)))

    y_p, psum, psumsq = _conv_pass(patches, w_p, tm, tk, tn)

    # Tiny (nm, Cp) reductions; the mean/var -> scale/shift fold itself happens
    # inside the BN kernel (per-channel rsqrt on the EUP).  Padded rows contribute
    # exact zeros, so we divide by the true M.
    inv_m = jnp.float32(1.0 / M)
    mean = jnp.sum(psum, axis=0) * inv_m        # (1, Cp)
    meansq = jnp.sum(psumsq, axis=0) * inv_m    # (1, Cp)
    g = jnp.pad(gamma.astype(jnp.float32), (0, Cp - cout)).reshape(1, Cp)
    b = jnp.pad(beta.astype(jnp.float32), (0, Cp - cout)).reshape(1, Cp)

    if residual_pad is not None:
        assert residual_pad.shape == (Mp, Cp), (residual_pad.shape, (Mp, Cp))

    out_p = _bn_act_pass(y_p, mean, meansq, g, b, residual_pad, relu,
                         tm, tn, out_dtype)
    return out_p, (B, Ho, Wo, M, Mp, Cp)


# --------------------------------------------------------------------------- #
# ResNetBlock forward (Pallas) — input/output in NCHW like the PyTorch module
# --------------------------------------------------------------------------- #
def resnet_block_pallas(x_nchw, params, stride):
    x = jnp.transpose(x_nchw, (0, 2, 3, 1)).astype(jnp.float32)   # NCHW -> NHWC
    cin = x.shape[-1]
    cout = params["w1"].shape[-1]

    # Stage 1: conv3x3(stride) + BN + ReLU  (emitted bf16: it only feeds the
    # stage-2 MXU, which consumes bf16 anyway -> no downstream cast, half the HBM)
    y1_p, (B, Ho, Wo, M, Mp, Cp) = fused_conv_bn_act(
        x, params["w1"], params["g1"], params["be1"],
        stride=stride, padding=1, relu=True, out_dtype=jnp.bfloat16)
    y1 = y1_p[:M, :cout].reshape(B, Ho, Wo, cout)

    # Shortcut: conv1x1(stride)+BN (bf16) or identity (f32), kept in the padded
    # (Mp, Cp) form so it feeds stage-2's fused residual add directly.
    if stride != 1 or cin != cout:
        sc_p, (_, _, _, Msc, Mpsc, Cpsc) = fused_conv_bn_act(
            x, params["wsc"], params["gsc"], params["besc"],
            stride=stride, padding=0, relu=False, out_dtype=jnp.bfloat16)
        assert (Msc, Mpsc, Cpsc) == (M, Mp, Cp)
    else:
        sc_p = jnp.pad(x.reshape(M, cin), ((0, Mp - M), (0, Cp - cin)))

    # Stage 2: conv3x3(1) + BN fused with residual add + final ReLU (f32 output)
    out_p, (B2, Ho2, Wo2, M2, Mp2, Cp2) = fused_conv_bn_act(
        y1, params["w2"], params["g2"], params["be2"],
        stride=1, padding=1, relu=True, residual_pad=sc_p,
        out_dtype=jnp.float32)
    assert (B2, Ho2, Wo2, M2, Mp2, Cp2) == (B, Ho, Wo, M, Mp, Cp)

    out = out_p[:M, :cout].reshape(B, Ho, Wo, cout)
    return jnp.transpose(out, (0, 3, 1, 2))                       # NHWC -> NCHW


# --------------------------------------------------------------------------- #
# Pure-JAX reference (mxu_dtype=bf16 mirrors the kernel's MXU input precision;
# intermediates stay f32, unlike the kernel's bf16 activations)
# --------------------------------------------------------------------------- #
def _ref_conv(x, w, b, stride, padding, mxu_dtype=None):
    lhs = x if mxu_dtype is None else x.astype(mxu_dtype)
    rhs = w if mxu_dtype is None else w.astype(mxu_dtype)
    y = jax.lax.conv_general_dilated(
        lhs, rhs, (stride, stride), [(padding, padding)] * 2,
        dimension_numbers=("NHWC", "HWIO", "NHWC"),
        preferred_element_type=jnp.float32)
    return y + b.reshape(1, 1, 1, -1)


def _ref_bn(y, g, be):
    mean = jnp.mean(y, axis=(0, 1, 2), keepdims=True)
    var = jnp.mean(jnp.square(y - mean), axis=(0, 1, 2), keepdims=True)
    return (y - mean) * jax.lax.rsqrt(var + BN_EPS) \
        * g.reshape(1, 1, 1, -1) + be.reshape(1, 1, 1, -1)


def resnet_block_ref(x_nchw, params, stride, mxu_dtype=None):
    x = jnp.transpose(x_nchw, (0, 2, 3, 1))
    cin = x.shape[-1]
    cout = params["w1"].shape[-1]
    y1 = jnp.maximum(
        _ref_bn(_ref_conv(x, params["w1"], params["b1"], stride, 1, mxu_dtype),
                params["g1"], params["be1"]), 0.0)
    main = _ref_bn(_ref_conv(y1, params["w2"], params["b2"], 1, 1, mxu_dtype),
                   params["g2"], params["be2"])
    if stride != 1 or cin != cout:
        sc = _ref_bn(_ref_conv(x, params["wsc"], params["bsc"], stride, 0, mxu_dtype),
                     params["gsc"], params["besc"])
    else:
        sc = x
    return jnp.transpose(jnp.maximum(main + sc, 0.0), (0, 3, 1, 2))


# --------------------------------------------------------------------------- #
# Deterministic parameter init (HWIO conv weights; conv biases kept for fidelity
# with nn.Conv2d defaults — they cancel exactly under BatchNorm in training mode)
# --------------------------------------------------------------------------- #
def init_params(key, cin, cout, stride):
    ks = jax.random.split(key, 12)
    p = {
        "w1": 0.1 * jax.random.normal(ks[0], (3, 3, cin, cout), jnp.float32),
        "b1": 0.1 * jax.random.normal(ks[1], (cout,), jnp.float32),
        "g1": 1.0 + 0.1 * jax.random.normal(ks[2], (cout,), jnp.float32),
        "be1": 0.1 * jax.random.normal(ks[3], (cout,), jnp.float32),
        "w2": 0.1 * jax.random.normal(ks[4], (3, 3, cout, cout), jnp.float32),
        "b2": 0.1 * jax.random.normal(ks[5], (cout,), jnp.float32),
        "g2": 1.0 + 0.1 * jax.random.normal(ks[6], (cout,), jnp.float32),
        "be2": 0.1 * jax.random.normal(ks[7], (cout,), jnp.float32),
    }
    if stride != 1 or cin != cout:
        p.update({
            "wsc": 0.1 * jax.random.normal(ks[8], (1, 1, cin, cout), jnp.float32),
            "bsc": 0.1 * jax.random.normal(ks[9], (cout,), jnp.float32),
            "gsc": 1.0 + 0.1 * jax.random.normal(ks[10], (cout,), jnp.float32),
            "besc": 0.1 * jax.random.normal(ks[11], (cout,), jnp.float32),
        })
    return p


if __name__ == "__main__":
    key = jax.random.PRNGKey(0)
    kx, kp1, kp2 = jax.random.split(key, 3)

    x = jax.random.normal(kx, (2, 4, 16, 16), jnp.float32)   # NCHW like PyTorch

    block_fwd = jax.jit(resnet_block_pallas, static_argnames=("stride",))

    # Tolerance: kernel stores bf16 intermediates (conv outputs / stage-1 activation
    # / projection shortcut) while the reference keeps f32 intermediates.
    ATOL = RTOL = 4e-2

    # Case 1: downsampling block with projection shortcut (stride=2, 4 -> 8 channels)
    params1 = init_params(kp1, cin=4, cout=8, stride=2)
    out1 = jax.block_until_ready(block_fwd(x, params1, stride=2))
    ref1 = resnet_block_ref(x, params1, stride=2, mxu_dtype=jnp.bfloat16)
    assert out1.shape == (2, 8, 8, 8), out1.shape
    assert jnp.allclose(out1, ref1, atol=ATOL, rtol=RTOL), \
        float(jnp.max(jnp.abs(out1 - ref1)))

    # Case 2: identity-shortcut block (stride=1, 4 -> 4 channels)
    params2 = init_params(kp2, cin=4, cout=4, stride=1)
    out2 = jax.block_until_ready(block_fwd(x, params2, stride=1))
    ref2 = resnet_block_ref(x, params2, stride=1, mxu_dtype=jnp.bfloat16)
    assert out2.shape == (2, 4, 16, 16), out2.shape
    assert jnp.allclose(out2, ref2, atol=ATOL, rtol=RTOL), \
        float(jnp.max(jnp.abs(out2 - ref2)))

    print("KERNEL_OK")
</pallas_src>

<mosaic_0001>
module attributes {stable_mosaic.version = 11 : i64} {
  func.func @_conv_stats_kernel(%arg0: i32, %arg1: i32, %arg2: i32, %arg3: memref<128x36xbf16, #tpu.memory_space<vmem>>, %arg4: memref<36x128xbf16, #tpu.memory_space<vmem>>, %arg5: memref<128x128xbf16, #tpu.memory_space<vmem>>, %arg6: memref<1x1x128xf32, #tpu.memory_space<vmem>>, %arg7: memref<1x1x128xf32, #tpu.memory_space<vmem>>, %arg8: memref<128x128xf32, #tpu.memory_space<vmem>>) attributes {dimension_semantics = [#tpu.dimension_semantics<parallel>, #tpu.dimension_semantics<parallel>, #tpu.dimension_semantics<arbitrary>], iteration_bounds = array<i64: 1, 1, 1>, scalar_prefetch = 0 : i64, scratch_operands = 1 : i64, tpu.core_type = #tpu.core_type<tc>, window_params = [{transform_indices = @transform_0, window_bounds = array<i64: 128, 36>}, {transform_indices = @transform_1, window_bounds = array<i64: 36, 128>}, {transform_indices = @transform_2, window_bounds = array<i64: 128, 128>}, {transform_indices = @transform_3, window_bounds = array<i64: 1, 1, 128>}, {transform_indices = @transform_4, window_bounds = array<i64: 1, 1, 128>}]} {
    %c0_i32 = arith.constant 0 : i32
    %0 = arith.cmpi eq, %arg2, %c0_i32 : i32
    %1 = arith.extui %0 : i1 to i32
    %c0_i32_0 = arith.constant 0 : i32
    %2 = arith.cmpi ne, %1, %c0_i32_0 : i32
    scf.if %2 {
      %cst_10 = arith.constant 0.000000e+00 : f32
      %12 = vector.broadcast %cst_10 : f32 to vector<128x128xf32>
      %c0_11 = arith.constant 0 : index
      %c0_12 = arith.constant 0 : index
      %13 = vector.load %arg8[%c0_11, %c0_12] : memref<128x128xf32, #tpu.memory_space<vmem>>, vector<128x128xf32>
      tpu.vector_store %arg8[%c0_11, %c0_12], %12 {strides = array<i32>} : memref<128x128xf32, #tpu.memory_space<vmem>>, vector<128x128xf32>,
    } else {
    }
    %c0 = arith.constant 0 : index
    %c0_1 = arith.constant 0 : index
    %3 = vector.load %arg8[%c0, %c0_1] : memref<128x128xf32, #tpu.memory_space<vmem>>, vector<128x128xf32>
    %c0_2 = arith.constant 0 : index
    %c0_3 = arith.constant 0 : index
    %4 = vector.load %arg3[%c0_2, %c0_3] : memref<128x36xbf16, #tpu.memory_space<vmem>>, vector<128x36xbf16>
    %c0_4 = arith.constant 0 : index
    %c0_5 = arith.constant 0 : index
    %5 = vector.load %arg4[%c0_4, %c0_5] : memref<36x128xbf16, #tpu.memory_space<vmem>>, vector<36x128xbf16>
    %cst = arith.constant dense<0.000000e+00> : vector<128x128xf32>
    %6 = tpu.matmul %4, %5, %cst {dimension_numbers = #tpu.dot_dimension_numbers<[1], [0], [0], [1], [0, 0, 1, 1], [], []>} : vector<128x36xbf16>, vector<36x128xbf16>, vector<128x128xf32> -> vector<128x128xf32>
    %7 = arith.addf %3, %6 : vector<128x128xf32>
    %c0_6 = arith.constant 0 : index
    %c0_7 = arith.constant 0 : index
    %8 = vector.load %arg8[%c0_6, %c0_7] : memref<128x128xf32, #tpu.memory_space<vmem>>, vector<128x128xf32>
    tpu.vector_store %arg8[%c0_6, %c0_7], %7 {strides = array<i32>} : memref<128x128xf32, #tpu.memory_space<vmem>>, vector<128x128xf32>,
    %c0_i32_8 = arith.constant 0 : i32
    %9 = arith.cmpi eq, %arg2, %c0_i32_8 : i32
    %10 = arith.extui %9 : i1 to i32
    %c0_i32_9 = arith.constant 0 : i32
    %11 = arith.cmpi ne, %10, %c0_i32_9 : i32
    scf.if %11 {
      %c0_10 = arith.constant 0 : index
      %c0_11 = arith.constant 0 : index
      %12 = vector.load %arg8[%c0_10, %c0_11] : memref<128x128xf32, #tpu.memory_space<vmem>>, vector<128x128xf32>
      %13 = arith.truncf %12 : vector<128x128xf32> to vector<128x128xbf16>
      %c0_12 = arith.constant 0 : index
      %c0_13 = arith.constant 0 : index
      %14 = vector.load %arg5[%c0_12, %c0_13] : memref<128x128xbf16, #tpu.memory_space<vmem>>, vector<128x128xbf16>
      tpu.vector_store %arg5[%c0_12, %c0_13], %13 {strides = array<i32>} : memref<128x128xbf16, #tpu.memory_space<vmem>>, vector<128x128xbf16>,
      %cst_14 = arith.constant dense<0.000000e+00> : vector<128xf32>
      %15 = vector.multi_reduction <add>, %12, %cst_14 [0] : vector<128x128xf32> to vector<128xf32>
      %16 = vector.shape_cast %15 : vector<128xf32> to vector<1x128xf32>
      %17 = vector.shape_cast %16 : vector<1x128xf32> to vector<1x1x128xf32>
      %c0_15 = arith.constant 0 : index
      %c0_16 = arith.constant 0 : index
      %c0_17 = arith.constant 0 : index
      %18 = vector.load %arg6[%c0_15, %c0_16, %c0_17] : memref<1x1x128xf32, #tpu.memory_space<vmem>>, vector<1x1x128xf32>
      tpu.vector_store %arg6[%c0_15, %c0_16, %c0_17], %17 {strides = array<i32>} : memref<1x1x128xf32, #tpu.memory_space<vmem>>, vector<1x1x128xf32>,
      %19 = arith.mulf %12, %12 : vector<128x128xf32>
      %cst_18 = arith.constant dense<0.000000e+00> : vector<128xf32>
      %20 = vector.multi_reduction <add>, %19, %cst_18 [0] : vector<128x128xf32> to vector<128xf32>
      %21 = vector.shape_cast %20 : vector<128xf32> to vector<1x128xf32>
      %22 = vector.shape_cast %21 : vector<1x128xf32> to vector<1x1x128xf32>
      %c0_19 = arith.constant 0 : index
      %c0_20 = arith.constant 0 : index
      %c0_21 = arith.constant 0 : index
      %23 = vector.load %arg7[%c0_19, %c0_20, %c0_21] : memref<1x1x128xf32, #tpu.memory_space<vmem>>, vector<1x1x128xf32>
      tpu.vector_store %arg7[%c0_19, %c0_20, %c0_21], %22 {strides = array<i32>} : memref<1x1x128xf32, #tpu.memory_space<vmem>>, vector<1x1x128xf32>,
    } else {
    }
    return
  }
  func.func @transform_0(%arg0: i32, %arg1: i32, %arg2: i32) -> (i32, i32) {
    %c0_i32 = arith.constant 0 : i32
    return %arg0, %arg2 : i32, i32
  }
  func.func @transform_1(%arg0: i32, %arg1: i32, %arg2: i32) -> (i32, i32) {
    %c0_i32 = arith.constant 0 : i32
    return %arg2, %arg1 : i32, i32
  }
  func.func @transform_2(%arg0: i32, %arg1: i32, %arg2: i32) -> (i32, i32) {
    %c0_i32 = arith.constant 0 : i32
    return %arg0, %arg1 : i32, i32
  }
  func.func @transform_3(%arg0: i32, %arg1: i32, %arg2: i32) -> (i32, i32, i32) {
    %c0_i32 = arith.constant 0 : i32
    %c0_i32_0 = arith.constant 0 : i32
    return %arg0, %c0_i32, %arg1 : i32, i32, i32
  }
  func.func @transform_4(%arg0: i32, %arg1: i32, %arg2: i32) -> (i32, i32, i32) {
    %c0_i32 = arith.constant 0 : i32
    %c0_i32_0 = arith.constant 0 : i32
    return %arg0, %c0_i32, %arg1 : i32, i32, i32
  }
}

module attributes {stable_mosaic.version = 11 : i64} {
  func.func @_bn_act_kernel(%arg0: i32, %arg1: i32, %arg2: memref<128x128xbf16, #tpu.memory_space<vmem>>, %arg3: memref<1x128xf32, #tpu.memory_space<vmem>>, %arg4: memref<1x128xf32, #tpu.memory_space<vmem>>, %arg5: memref<1x128xf32, #tpu.memory_space<vmem>>, %arg6: memref<1x128xf32, #tpu.memory_space<vmem>>, %arg7: memref<128x128xbf16, #tpu.memory_space<vmem>>) attributes {dimension_semantics = [#tpu.dimension_semantics<parallel>, #tpu.dimension_semantics<parallel>], iteration_bounds = array<i64: 1, 1>, scalar_prefetch = 0 : i64, scratch_operands = 0 : i64, tpu.core_type = #tpu.core_type<tc>, window_params = [{transform_indices = @transform_0, window_bounds = array<i64: 128, 128>}, {transform_indices = @transform_1, window_bounds = array<i64: 1, 128>}, {transform_indices = @transform_2, window_bounds = array<i64: 1, 128>}, {transform_indices = @transform_3, window_bounds = array<i64: 1, 128>}, {transform_indices = @transform_4, window_bounds = array<i64: 1, 128>}, {transform_indices = @transform_5, window_bounds = array<i64: 128, 128>}]} {
    %c0 = arith.constant 0 : index
    %c0_0 = arith.constant 0 : index
    %0 = vector.load %arg3[%c0, %c0_0] : memref<1x128xf32, #tpu.memory_space<vmem>>, vector<1x128xf32>
    %c0_1 = arith.constant 0 : index
    %c0_2 = arith.constant 0 : index
    %1 = vector.load %arg4[%c0_1, %c0_2] : memref<1x128xf32, #tpu.memory_space<vmem>>, vector<1x128xf32>
    %2 = arith.mulf %0, %0 : vector<1x128xf32>
    %3 = arith.subf %1, %2 : vector<1x128xf32>
    %cst = arith.constant 0.000000e+00 : f32
    %4 = vector.broadcast %cst : f32 to vector<1x128xf32>
    %5 = arith.maximumf %3, %4 : vector<1x128xf32>
    %c0_3 = arith.constant 0 : index
    %c0_4 = arith.constant 0 : index
    %6 = vector.load %arg5[%c0_3, %c0_4] : memref<1x128xf32, #tpu.memory_space<vmem>>, vector<1x128xf32>
    %cst_5 = arith.constant 9.99999974E-6 : f32
    %7 = vector.broadcast %cst_5 : f32 to vector<1x128xf32>
    %8 = arith.addf %5, %7 : vector<1x128xf32>
    %9 = math.rsqrt %8 : vector<1x128xf32>
    %10 = arith.mulf %6, %9 : vector<1x128xf32>
    %c0_6 = arith.constant 0 : index
    %c0_7 = arith.constant 0 : index
    %11 = vector.load %arg6[%c0_6, %c0_7] : memref<1x128xf32, #tpu.memory_space<vmem>>, vector<1x128xf32>
    %12 = arith.mulf %0, %10 : vector<1x128xf32>
    %13 = arith.subf %11, %12 : vector<1x128xf32>
    %c0_8 = arith.constant 0 : index
    %c0_9 = arith.constant 0 : index
    %14 = vector.load %arg2[%c0_8, %c0_9] : memref<128x128xbf16, #tpu.memory_space<vmem>>, vector<128x128xbf16>
    %15 = arith.extf %14 : vector<128x128xbf16> to vector<128x128xf32>
    %16 = vector.broadcast %10 : vector<1x128xf32> to vector<128x128xf32>
    %17 = arith.mulf %15, %16 : vector<128x128xf32>
    %18 = vector.broadcast %13 : vector<1x128xf32> to vector<128x128xf32>
    %19 = arith.addf %17, %18 : vector<128x128xf32>
    %cst_10 = arith.constant 0.000000e+00 : f32
    %20 = vector.broadcast %cst_10 : f32 to vector<128x128xf32>
    %21 = arith.maximumf %19, %20 : vector<128x128xf32>
    %22 = arith.truncf %21 : vector<128x128xf32> to vector<128x128xbf16>
    %c0_11 = arith.constant 0 : index
    %c0_12 = arith.constant 0 : index
    %23 = vector.load %arg7[%c0_11, %c0_12] : memref<128x128xbf16, #tpu.memory_space<vmem>>, vector<128x128xbf16>
    tpu.vector_store %arg7[%c0_11, %c0_12], %22 {strides = array<i32>} : memref<128x128xbf16, #tpu.memory_space<vmem>>, vector<128x128xbf16>,
    return
  }
  func.func @transform_0(%arg0: i32, %arg1: i32) -> (i32, i32) {
    %c0_i32 = arith.constant 0 : i32
    return %arg0, %arg1 : i32, i32
  }
  func.func @transform_1(%arg0: i32, %arg1: i32) -> (i32, i32) {
    %c0_i32 = arith.constant 0 : i32
    %c0_i32_0 = arith.constant 0 : i32
    return %c0_i32, %arg1 : i32, i32
  }
  func.func @transform_2(%arg0: i32, %arg1: i32) -> (i32, i32) {
    %c0_i32 = arith.constant 0 : i32
    %c0_i32_0 = arith.constant 0 : i32
    return %c0_i32, %arg1 : i32, i32
  }
  func.func @transform_3(%arg0: i32, %arg1: i32) -> (i32, i32) {
    %c0_i32 = arith.constant 0 : i32
    %c0_i32_0 = arith.constant 0 : i32
    return %c0_i32, %arg1 : i32, i32
  }
  func.func @transform_4(%arg0: i32, %arg1: i32) -> (i32, i32) {
    %c0_i32 = arith.constant 0 : i32
    %c0_i32_0 = arith.constant 0 : i32
    return %c0_i32, %arg1 : i32, i32
  }
  func.func @transform_5(%arg0: i32, %arg1: i32) -> (i32, i32) {
    %c0_i32 = arith.constant 0 : i32
    return %arg0, %arg1 : i32, i32
  }
}

module attributes {stable_mosaic.version = 11 : i64} {
  func.func @_conv_stats_kernel(%arg0: i32, %arg1: i32, %arg2: i32, %arg3: memref<128x72xbf16, #tpu.memory_space<vmem>>, %arg4: memref<72x128xbf16, #tpu.memory_space<vmem>>, %arg5: memref<128x128xbf16, #tpu.memory_space<vmem>>, %arg6: memref<1x1x128xf32, #tpu.memory_space<vmem>>, %arg7: memref<1x1x128xf32, #tpu.memory_space<vmem>>, %arg8: memref<128x128xf32, #tpu.memory_space<vmem>>) attributes {dimension_semantics = [#tpu.dimension_semantics<parallel>, #tpu.dimension_semantics<parallel>, #tpu.dimension_semantics<arbitrary>], iteration_bounds = array<i64: 1, 1, 1>, scalar_prefetch = 0 : i64, scratch_operands = 1 : i64, tpu.core_type = #tpu.core_type<tc>, window_params = [{transform_indices = @transform_0, window_bounds = array<i64: 128, 72>}, {transform_indices = @transform_1, window_bounds = array<i64: 72, 128>}, {transform_indices = @transform_2, window_bounds = array<i64: 128, 128>}, {transform_indices = @transform_3, window_bounds = array<i64: 1, 1, 128>}, {transform_indices = @transform_4, window_bounds = array<i64: 1, 1, 128>}]} {
    %c0_i32 = arith.constant 0 : i32
    %0 = arith.cmpi eq, %arg2, %c0_i32 : i32
    %1 = arith.extui %0 : i1 to i32
    %c0_i32_0 = arith.constant 0 : i32
    %2 = arith.cmpi ne, %1, %c0_i32_0 : i32
    scf.if %2 {
      %cst_10 = arith.constant 0.000000e+00 : f32
      %12 = vector.broadcast %cst_10 : f32 to vector<128x128xf32>
      %c0_11 = arith.constant 0 : index
      %c0_12 = arith.constant 0 : index
      %13 = vector.load %arg8[%c0_11, %c0_12] : memref<128x128xf32, #tpu.memory_space<vmem>>, vector<128x128xf32>
      tpu.vector_store %arg8[%c0_11, %c0_12], %12 {strides = array<i32>} : memref<128x128xf32, #tpu.memory_space<vmem>>, vector<128x128xf32>,
    } else {
    }
    %c0 = arith.constant 0 : index
    %c0_1 = arith.constant 0 : index
    %3 = vector.load %arg8[%c0, %c0_1] : memref<128x128xf32, #tpu.memory_space<vmem>>, vector<128x128xf32>
    %c0_2 = arith.constant 0 : index
    %c0_3 = arith.constant 0 : index
    %4 = vector.load %arg3[%c0_2, %c0_3] : memref<128x72xbf16, #tpu.memory_space<vmem>>, vector<128x72xbf16>
    %c0_4 = arith.constant 0 : index
    %c0_5 = arith.constant 0 : index
    %5 = vector.load %arg4[%c0_4, %c0_5] : memref<72x128xbf16, #tpu.memory_space<vmem>>, vector<72x128xbf16>
    %cst = arith.constant dense<0.000000e+00> : vector<128x128xf32>
    %6 = tpu.matmul %4, %5, %cst {dimension_numbers = #tpu.dot_dimension_numbers<[1], [0], [0], [1], [0, 0, 1, 1], [], []>} : vector<128x72xbf16>, vector<72x128xbf16>, vector<128x128xf32> -> vector<128x128xf32>
    %7 = arith.addf %3, %6 : vector<128x128xf32>
    %c0_6 = arith.constant 0 : index
    %c0_7 = arith.constant 0 : index
    %8 = vector.load %arg8[%c0_6, %c0_7] : memref<128x128xf32, #tpu.memory_space<vmem>>, vector<128x128xf32>
    tpu.vector_store %arg8[%c0_6, %c0_7], %7 {strides = array<i32>} : memref<128x128xf32, #tpu.memory_space<vmem>>, vector<128x128xf32>,
    %c0_i32_8 = arith.constant 0 : i32
    %9 = arith.cmpi eq, %arg2, %c0_i32_8 : i32
    %10 = arith.extui %9 : i1 to i32
    %c0_i32_9 = arith.constant 0 : i32
    %11 = arith.cmpi ne, %10, %c0_i32_9 : i32
    scf.if %11 {
      %c0_10 = arith.constant 0 : index
      %c0_11 = arith.constant 0 : index
      %12 = vector.load %arg8[%c0_10, %c0_11] : memref<128x128xf32, #tpu.memory_space<vmem>>, vector<128x128xf32>
      %13 = arith.truncf %12 : vector<128x128xf32> to vector<128x128xbf16>
      %c0_12 = arith.constant 0 : index
      %c0_13 = arith.constant 0 : index
      %14 = vector.load %arg5[%c0_12, %c0_13] : memref<128x128xbf16, #tpu.memory_space<vmem>>, vector<128x128xbf16>
      tpu.vector_store %arg5[%c0_12, %c0_13], %13 {strides = array<i32>} : memref<128x128xbf16, #tpu.memory_space<vmem>>, vector<128x128xbf16>,
      %cst_14 = arith.constant dense<0.000000e+00> : vector<128xf32>
      %15 = vector.multi_reduction <add>, %12, %cst_14 [0] : vector<128x128xf32> to vector<128xf32>
      %16 = vector.shape_cast %15 : vector<128xf32> to vector<1x128xf32>
      %17 = vector.shape_cast %16 : vector<1x128xf32> to vector<1x1x128xf32>
      %c0_15 = arith.constant 0 : index
      %c0_16 = arith.constant 0 : index
      %c0_17 = arith.constant 0 : index
      %18 = vector.load %arg6[%c0_15, %c0_16, %c0_17] : memref<1x1x128xf32, #tpu.memory_space<vmem>>, vector<1x1x128xf32>
      tpu.vector_store %arg6[%c0_15, %c0_16, %c0_17], %17 {strides = array<i32>} : memref<1x1x128xf32, #tpu.memory_space<vmem>>, vector<1x1x128xf32>,
      %19 = arith.mulf %12, %12 : vector<128x128xf32>
      %cst_18 = arith.constant dense<0.000000e+00> : vector<128xf32>
      %20 = vector.multi_reduction <add>, %19, %cst_18 [0] : vector<128x128xf32> to vector<128xf32>
      %21 = vector.shape_cast %20 : vector<128xf32> to vector<1x128xf32>
      %22 = vector.shape_cast %21 : vector<1x128xf32> to vector<1x1x128xf32>
      %c0_19 = arith.constant 0 : index
      %c0_20 = arith.constant 0 : index
      %c0_21 = arith.constant 0 : index
      %23 = vector.load %arg7[%c0_19, %c0_20, %c0_21] : memref<1x1x128xf32, #tpu.memory_space<vmem>>, vector<1x1x128xf32>
      tpu.vector_store %arg7[%c0_19, %c0_20, %c0_21], %22 {strides = array<i32>} : memref<1x1x128xf32, #tpu.memory_space<vmem>>, vector<1x1x128xf32>,
    } else {
    }
    return
  }
  func.func @transform_0(%arg0: i32, %arg1: i32, %arg2: i32) -> (i32, i32) {
    %c0_i32 = arith.constant 0 : i32
    return %arg0, %arg2 : i32, i32
  }
  func.func @transform_1(%arg0: i32, %arg1: i32, %arg2: i32) -> (i32, i32) {
    %c0_i32 = arith.constant 0 : i32
    return %arg2, %arg1 : i32, i32
  }
  func.func @transform_2(%arg0: i32, %arg1: i32, %arg2: i32) -> (i32, i32) {
    %c0_i32 = arith.constant 0 : i32
    return %arg0, %arg1 : i32, i32
  }
  func.func @transform_3(%arg0: i32, %arg1: i32, %arg2: i32) -> (i32, i32, i32) {
    %c0_i32 = arith.constant 0 : i32
    %c0_i32_0 = arith.constant 0 : i32
    return %arg0, %c0_i32, %arg1 : i32, i32, i32
  }
  func.func @transform_4(%arg0: i32, %arg1: i32, %arg2: i32) -> (i32, i32, i32) {
    %c0_i32 = arith.constant 0 : i32
    %c0_i32_0 = arith.constant 0 : i32
    return %arg0, %c0_i32, %arg1 : i32, i32, i32
  }
}

module attributes {stable_mosaic.version = 11 : i64} {
  func.func @_bn_act_kernel(%arg0: i32, %arg1: i32, %arg2: memref<128x128xbf16, #tpu.memory_space<vmem>>, %arg3: memref<1x128xf32, #tpu.memory_space<vmem>>, %arg4: memref<1x128xf32, #tpu.memory_space<vmem>>, %arg5: memref<1x128xf32, #tpu.memory_space<vmem>>, %arg6: memref<1x128xf32, #tpu.memory_space<vmem>>, %arg7: memref<128x128xbf16, #tpu.memory_space<vmem>>, %arg8: memref<128x128xf32, #tpu.memory_space<vmem>>) attributes {dimension_semantics = [#tpu.dimension_semantics<parallel>, #tpu.dimension_semantics<parallel>], iteration_bounds = array<i64: 1, 1>, scalar_prefetch = 0 : i64, scratch_operands = 0 : i64, tpu.core_type = #tpu.core_type<tc>, window_params = [{transform_indices = @transform_0, window_bounds = array<i64: 128, 128>}, {transform_indices = @transform_1, window_bounds = array<i64: 1, 128>}, {transform_indices = @transform_2, window_bounds = array<i64: 1, 128>}, {transform_indices = @transform_3, window_bounds = array<i64: 1, 128>}, {transform_indices = @transform_4, window_bounds = array<i64: 1, 128>}, {transform_indices = @transform_5, window_bounds = array<i64: 128, 128>}, {transform_indices = @transform_6, window_bounds = array<i64: 128, 128>}]} {
    %c0 = arith.constant 0 : index
    %c0_0 = arith.constant 0 : index
    %0 = vector.load %arg3[%c0, %c0_0] : memref<1x128xf32, #tpu.memory_space<vmem>>, vector<1x128xf32>
    %c0_1 = arith.constant 0 : index
    %c0_2 = arith.constant 0 : index
    %1 = vector.load %arg4[%c0_1, %c0_2] : memref<1x128xf32, #tpu.memory_space<vmem>>, vector<1x128xf32>
    %2 = arith.mulf %0, %0 : vector<1x128xf32>
    %3 = arith.subf %1, %2 : vector<1x128xf32>
    %cst = arith.constant 0.000000e+00 : f32
    %4 = vector.broadcast %cst : f32 to vector<1x128xf32>
    %5 = arith.maximumf %3, %4 : vector<1x128xf32>
    %c0_3 = arith.constant 0 : index
    %c0_4 = arith.constant 0 : index
    %6 = vector.load %arg5[%c0_3, %c0_4] : memref<1x128xf32, #tpu.memory_space<vmem>>, vector<1x128xf32>
    %cst_5 = arith.constant 9.99999974E-6 : f32
    %7 = vector.broadcast %cst_5 : f32 to vector<1x128xf32>
    %8 = arith.addf %5, %7 : vector<1x128xf32>
    %9 = math.rsqrt %8 : vector<1x128xf32>
    %10 = arith.mulf %6, %9 : vector<1x128xf32>
    %c0_6 = arith.constant 0 : index
    %c0_7 = arith.constant 0 : index
    %11 = vector.load %arg6[%c0_6, %c0_7] : memref<1x128xf32, #tpu.memory_space<vmem>>, vector<1x128xf32>
    %12 = arith.mulf %0, %10 : vector<1x128xf32>
    %13 = arith.subf %11, %12 : vector<1x128xf32>
    %c0_8 = arith.constant 0 : index
    %c0_9 = arith.constant 0 : index
    %14 = vector.load %arg2[%c0_8, %c0_9] : memref<128x128xbf16, #tpu.memory_space<vmem>>, vector<128x128xbf16>
    %15 = arith.extf %14 : vector<128x128xbf16> to vector<128x128xf32>
    %16 = vector.broadcast %10 : vector<1x128xf32> to vector<128x128xf32>
    %17 = arith.mulf %15, %16 : vector<128x128xf32>
    %18 = vector.broadcast %13 : vector<1x128xf32> to vector<128x128xf32>
    %19 = arith.addf %17, %18 : vector<128x128xf32>
    %c0_10 = arith.constant 0 : index
    %c0_11 = arith.constant 0 : index
    %20 = vector.load %arg7[%c0_10, %c0_11] : memref<128x128xbf16, #tpu.memory_space<vmem>>, vector<128x128xbf16>
    %21 = arith.extf %20 : vector<128x128xbf16> to vector<128x128xf32>
    %22 = arith.addf %19, %21 : vector<128x128xf32>
    %cst_12 = arith.constant 0.000000e+00 : f32
    %23 = vector.broadcast %cst_12 : f32 to vector<128x128xf32>
    %24 = arith.maximumf %22, %23 : vector<128x128xf32>
    %c0_13 = arith.constant 0 : index
    %c0_14 = arith.constant 0 : index
    %25 = vector.load %arg8[%c0_13, %c0_14] : memref<128x128xf32, #tpu.memory_space<vmem>>, vector<128x128xf32>
    tpu.vector_store %arg8[%c0_13, %c0_14], %24 {strides = array<i32>} : memref<128x128xf32, #tpu.memory_space<vmem>>, vector<128x128xf32>,
    return
  }
  func.func @transform_0(%arg0: i32, %arg1: i32) -> (i32, i32) {
    %c0_i32 = arith.constant 0 : i32
    return %arg0, %arg1 : i32, i32
  }
  func.func @transform_1(%arg0: i32, %arg1: i32) -> (i32, i32) {
    %c0_i32 = arith.constant 0 : i32
    %c0_i32_0 = arith.constant 0 : i32
    return %c0_i32, %arg1 : i32, i32
  }
  func.func @transform_2(%arg0: i32, %arg1: i32) -> (i32, i32) {
    %c0_i32 = arith.constant 0 : i32
    %c0_i32_0 = arith.constant 0 : i32
    return %c0_i32, %arg1 : i32, i32
  }
  func.func @transform_3(%arg0: i32, %arg1: i32) -> (i32, i32) {
    %c0_i32 = arith.constant 0 : i32
    %c0_i32_0 = arith.constant 0 : i32
    return %c0_i32, %arg1 : i32, i32
  }
  func.func @transform_4(%arg0: i32, %arg1: i32) -> (i32, i32) {
    %c0_i32 = arith.constant 0 : i32
    %c0_i32_0 = arith.constant 0 : i32
    return %c0_i32, %arg1 : i32, i32
  }
  func.func @transform_5(%arg0: i32, %arg1: i32) -> (i32, i32) {
    %c0_i32 = arith.constant 0 : i32
    return %arg0, %arg1 : i32, i32
  }
  func.func @transform_6(%arg0: i32, %arg1: i32) -> (i32, i32) {
    %c0_i32 = arith.constant 0 : i32
    return %arg0, %arg1 : i32, i32
  }
}

module attributes {stable_mosaic.version = 11 : i64} {
  func.func @_conv_stats_kernel(%arg0: i32, %arg1: i32, %arg2: i32, %arg3: memref<128x4xbf16, #tpu.memory_space<vmem>>, %arg4: memref<4x128xbf16, #tpu.memory_space<vmem>>, %arg5: memref<128x128xbf16, #tpu.memory_space<vmem>>, %arg6: memref<1x1x128xf32, #tpu.memory_space<vmem>>, %arg7: memref<1x1x128xf32, #tpu.memory_space<vmem>>, %arg8: memref<128x128xf32, #tpu.memory_space<vmem>>) attributes {dimension_semantics = [#tpu.dimension_semantics<parallel>, #tpu.dimension_semantics<parallel>, #tpu.dimension_semantics<arbitrary>], iteration_bounds = array<i64: 1, 1, 1>, scalar_prefetch = 0 : i64, scratch_operands = 1 : i64, tpu.core_type = #tpu.core_type<tc>, window_params = [{transform_indices = @transform_0, window_bounds = array<i64: 128, 4>}, {transform_indices = @transform_1, window_bounds = array<i64: 4, 128>}, {transform_indices = @transform_2, window_bounds = array<i64: 128, 128>}, {transform_indices = @transform_3, window_bounds = array<i64: 1, 1, 128>}, {transform_indices = @transform_4, window_bounds = array<i64: 1, 1, 128>}]} {
    %c0_i32 = arith.constant 0 : i32
    %0 = arith.cmpi eq, %arg2, %c0_i32 : i32
    %1 = arith.extui %0 : i1 to i32
    %c0_i32_0 = arith.constant 0 : i32
    %2 = arith.cmpi ne, %1, %c0_i32_0 : i32
    scf.if %2 {
      %cst_10 = arith.constant 0.000000e+00 : f32
      %12 = vector.broadcast %cst_10 : f32 to vector<128x128xf32>
      %c0_11 = arith.constant 0 : index
      %c0_12 = arith.constant 0 : index
      %13 = vector.load %arg8[%c0_11, %c0_12] : memref<128x128xf32, #tpu.memory_space<vmem>>, vector<128x128xf32>
      tpu.vector_store %arg8[%c0_11, %c0_12], %12 {strides = array<i32>} : memref<128x128xf32, #tpu.memory_space<vmem>>, vector<128x128xf32>,
    } else {
    }
    %c0 = arith.constant 0 : index
    %c0_1 = arith.constant 0 : index
    %3 = vector.load %arg8[%c0, %c0_1] : memref<128x128xf32, #tpu.memory_space<vmem>>, vector<128x128xf32>
    %c0_2 = arith.constant 0 : index
    %c0_3 = arith.constant 0 : index
    %4 = vector.load %arg3[%c0_2, %c0_3] : memref<128x4xbf16, #tpu.memory_space<vmem>>, vector<128x4xbf16>
    %c0_4 = arith.constant 0 : index
    %c0_5 = arith.constant 0 : index
    %5 = vector.load %arg4[%c0_4, %c0_5] : memref<4x128xbf16, #tpu.memory_space<vmem>>, vector<4x128xbf16>
    %cst = arith.constant dense<0.000000e+00> : vector<128x128xf32>
    %6 = tpu.matmul %4, %5, %cst {dimension_numbers = #tpu.dot_dimension_numbers<[1], [0], [0], [1], [0, 0, 1, 1], [], []>} : vector<128x4xbf16>, vector<4x128xbf16>, vector<128x128xf32> -> vector<128x128xf32>
    %7 = arith.addf %3, %6 : vector<128x128xf32>
    %c0_6 = arith.constant 0 : index
    %c0_7 = arith.constant 0 : index
    %8 = vector.load %arg8[%c0_6, %c0_7] : memref<128x128xf32, #tpu.memory_space<vmem>>, vector<128x128xf32>
    tpu.vector_store %arg8[%c0_6, %c0_7], %7 {strides = array<i32>} : memref<128x128xf32, #tpu.memory_space<vmem>>, vector<128x128xf32>,
    %c0_i32_8 = arith.constant 0 : i32
    %9 = arith.cmpi eq, %arg2, %c0_i32_8 : i32
    %10 = arith.extui %9 : i1 to i32
    %c0_i32_9 = arith.constant 0 : i32
    %11 = arith.cmpi ne, %10, %c0_i32_9 : i32
    scf.if %11 {
      %c0_10 = arith.constant 0 : index
      %c0_11 = arith.constant 0 : index
      %12 = vector.load %arg8[%c0_10, %c0_11] : memref<128x128xf32, #tpu.memory_space<vmem>>, vector<128x128xf32>
      %13 = arith.truncf %12 : vector<128x128xf32> to vector<128x128xbf16>
      %c0_12 = arith.constant 0 : index
      %c0_13 = arith.constant 0 : index
      %14 = vector.load %arg5[%c0_12, %c0_13] : memref<128x128xbf16, #tpu.memory_space<vmem>>, vector<128x128xbf16>
      tpu.vector_store %arg5[%c0_12, %c0_13], %13 {strides = array<i32>} : memref<128x128xbf16, #tpu.memory_space<vmem>>, vector<128x128xbf16>,
      %cst_14 = arith.constant dense<0.000000e+00> : vector<128xf32>
      %15 = vector.multi_reduction <add>, %12, %cst_14 [0] : vector<128x128xf32> to vector<128xf32>
      %16 = vector.shape_cast %15 : vector<128xf32> to vector<1x128xf32>
      %17 = vector.shape_cast %16 : vector<1x128xf32> to vector<1x1x128xf32>
      %c0_15 = arith.constant 0 : index
      %c0_16 = arith.constant 0 : index
      %c0_17 = arith.constant 0 : index
      %18 = vector.load %arg6[%c0_15, %c0_16, %c0_17] : memref<1x1x128xf32, #tpu.memory_space<vmem>>, vector<1x1x128xf32>
      tpu.vector_store %arg6[%c0_15, %c0_16, %c0_17], %17 {strides = array<i32>} : memref<1x1x128xf32, #tpu.memory_space<vmem>>, vector<1x1x128xf32>,
      %19 = arith.mulf %12, %12 : vector<128x128xf32>
      %cst_18 = arith.constant dense<0.000000e+00> : vector<128xf32>
      %20 = vector.multi_reduction <add>, %19, %cst_18 [0] : vector<128x128xf32> to vector<128xf32>
      %21 = vector.shape_cast %20 : vector<128xf32> to vector<1x128xf32>
      %22 = vector.shape_cast %21 : vector<1x128xf32> to vector<1x1x128xf32>
      %c0_19 = arith.constant 0 : index
      %c0_20 = arith.constant 0 : index
      %c0_21 = arith.constant 0 : index
      %23 = vector.load %arg7[%c0_19, %c0_20, %c0_21] : memref<1x1x128xf32, #tpu.memory_space<vmem>>, vector<1x1x128xf32>
      tpu.vector_store %arg7[%c0_19, %c0_20, %c0_21], %22 {strides = array<i32>} : memref<1x1x128xf32, #tpu.memory_space<vmem>>, vector<1x1x128xf32>,
    } else {
    }
    return
  }
  func.func @transform_0(%arg0: i32, %arg1: i32, %arg2: i32) -> (i32, i32) {
    %c0_i32 = arith.constant 0 : i32
    return %arg0, %arg2 : i32, i32
  }
  func.func @transform_1(%arg0: i32, %arg1: i32, %arg2: i32) -> (i32, i32) {
    %c0_i32 = arith.constant 0 : i32
    return %arg2, %arg1 : i32, i32
  }
  func.func @transform_2(%arg0: i32, %arg1: i32, %arg2: i32) -> (i32, i32) {
    %c0_i32 = arith.constant 0 : i32
    return %arg0, %arg1 : i32, i32
  }
  func.func @transform_3(%arg0: i32, %arg1: i32, %arg2: i32) -> (i32, i32, i32) {
    %c0_i32 = arith.constant 0 : i32
    %c0_i32_0 = arith.constant 0 : i32
    return %arg0, %c0_i32, %arg1 : i32, i32, i32
  }
  func.func @transform_4(%arg0: i32, %arg1: i32, %arg2: i32) -> (i32, i32, i32) {
    %c0_i32 = arith.constant 0 : i32
    %c0_i32_0 = arith.constant 0 : i32
    return %arg0, %c0_i32, %arg1 : i32, i32, i32
  }
}

module attributes {stable_mosaic.version = 11 : i64} {
  func.func @_bn_act_kernel(%arg0: i32, %arg1: i32, %arg2: memref<128x128xbf16, #tpu.memory_space<vmem>>, %arg3: memref<1x128xf32, #tpu.memory_space<vmem>>, %arg4: memref<1x128xf32, #tpu.memory_space<vmem>>, %arg5: memref<1x128xf32, #tpu.memory_space<vmem>>, %arg6: memref<1x128xf32, #tpu.memory_space<vmem>>, %arg7: memref<128x128xbf16, #tpu.memory_space<vmem>>) attributes {dimension_semantics = [#tpu.dimension_semantics<parallel>, #tpu.dimension_semantics<parallel>], iteration_bounds = array<i64: 1, 1>, scalar_prefetch = 0 : i64, scratch_operands = 0 : i64, tpu.core_type = #tpu.core_type<tc>, window_params = [{transform_indices = @transform_0, window_bounds = array<i64: 128, 128>}, {transform_indices = @transform_1, window_bounds = array<i64: 1, 128>}, {transform_indices = @transform_2, window_bounds = array<i64: 1, 128>}, {transform_indices = @transform_3, window_bounds = array<i64: 1, 128>}, {transform_indices = @transform_4, window_bounds = array<i64: 1, 128>}, {transform_indices = @transform_5, window_bounds = array<i64: 128, 128>}]} {
    %c0 = arith.constant 0 : index
    %c0_0 = arith.constant 0 : index
    %0 = vector.load %arg3[%c0, %c0_0] : memref<1x128xf32, #tpu.memory_space<vmem>>, vector<1x128xf32>
    %c0_1 = arith.constant 0 : index
    %c0_2 = arith.constant 0 : index
    %1 = vector.load %arg4[%c0_1, %c0_2] : memref<1x128xf32, #tpu.memory_space<vmem>>, vector<1x128xf32>
    %2 = arith.mulf %0, %0 : vector<1x128xf32>
    %3 = arith.subf %1, %2 : vector<1x128xf32>
    %cst = arith.constant 0.000000e+00 : f32
    %4 = vector.broadcast %cst : f32 to vector<1x128xf32>
    %5 = arith.maximumf %3, %4 : vector<1x128xf32>
    %c0_3 = arith.constant 0 : index
    %c0_4 = arith.constant 0 : index
    %6 = vector.load %arg5[%c0_3, %c0_4] : memref<1x128xf32, #tpu.memory_space<vmem>>, vector<1x128xf32>
    %cst_5 = arith.constant 9.99999974E-6 : f32
    %7 = vector.broadcast %cst_5 : f32 to vector<1x128xf32>
    %8 = arith.addf %5, %7 : vector<1x128xf32>
    %9 = math.rsqrt %8 : vector<1x128xf32>
    %10 = arith.mulf %6, %9 : vector<1x128xf32>
    %c0_6 = arith.constant 0 : index
    %c0_7 = arith.constant 0 : index
    %11 = vector.load %arg6[%c0_6, %c0_7] : memref<1x128xf32, #tpu.memory_space<vmem>>, vector<1x128xf32>
    %12 = arith.mulf %0, %10 : vector<1x128xf32>
    %13 = arith.subf %11, %12 : vector<1x128xf32>
    %c0_8 = arith.constant 0 : index
    %c0_9 = arith.constant 0 : index
    %14 = vector.load %arg2[%c0_8, %c0_9] : memref<128x128xbf16, #tpu.memory_space<vmem>>, vector<128x128xbf16>
    %15 = arith.extf %14 : vector<128x128xbf16> to vector<128x128xf32>
    %16 = vector.broadcast %10 : vector<1x128xf32> to vector<128x128xf32>
    %17 = arith.mulf %15, %16 : vector<128x128xf32>
    %18 = vector.broadcast %13 : vector<1x128xf32> to vector<128x128xf32>
    %19 = arith.addf %17, %18 : vector<128x128xf32>
    %20 = arith.truncf %19 : vector<128x128xf32> to vector<128x128xbf16>
    %c0_10 = arith.constant 0 : index
    %c0_11 = arith.constant 0 : index
    %21 = vector.load %arg7[%c0_10, %c0_11] : memref<128x128xbf16, #tpu.memory_space<vmem>>, vector<128x128xbf16>
    tpu.vector_store %arg7[%c0_10, %c0_11], %20 {strides = array<i32>} : memref<128x128xbf16, #tpu.memory_space<vmem>>, vector<128x128xbf16>,
    return
  }
  func.func @transform_0(%arg0: i32, %arg1: i32) -> (i32, i32) {
    %c0_i32 = arith.constant 0 : i32
    return %arg0, %arg1 : i32, i32
  }
  func.func @transform_1(%arg0: i32, %arg1: i32) -> (i32, i32) {
    %c0_i32 = arith.constant 0 : i32
    %c0_i32_0 = arith.constant 0 : i32
    return %c0_i32, %arg1 : i32, i32
  }
  func.func @transform_2(%arg0: i32, %arg1: i32) -> (i32, i32) {
    %c0_i32 = arith.constant 0 : i32
    %c0_i32_0 = arith.constant 0 : i32
    return %c0_i32, %arg1 : i32, i32
  }
  func.func @transform_3(%arg0: i32, %arg1: i32) -> (i32, i32) {
    %c0_i32 = arith.constant 0 : i32
    %c0_i32_0 = arith.constant 0 : i32
    return %c0_i32, %arg1 : i32, i32
  }
  func.func @transform_4(%arg0: i32, %arg1: i32) -> (i32, i32) {
    %c0_i32 = arith.constant 0 : i32
    %c0_i32_0 = arith.constant 0 : i32
    return %c0_i32, %arg1 : i32, i32
  }
  func.func @transform_5(%arg0: i32, %arg1: i32) -> (i32, i32) {
    %c0_i32 = arith.constant 0 : i32
    return %arg0, %arg1 : i32, i32
  }
}

</mosaic_0001>

<bundles_post_ra>
// kernel: resnet_block_pallas.7
= control target key start
LH: loop header
LB: loop body
LE: loop exit
PB: predicated region body
PF: predicated region fallthrough
CT: control target
= control target key end

     0   :  { %v65_v6 = vlaneseq  ;;  %s422_s1 = inlined_call_operand.vmem [shape: f32[1,128], index: 1, kind: input, shape index: {}]   ;;  %s423_s2 = inlined_call_operand.vmem [shape: f32[1,128], index: 2, kind: input, shape index: {}]   ;;  %s424_s0 = inlined_call_operand.vmem [shape: bf16[128,128], index: 0, kind: input, shape index: {}]   ;;  %s425_s3 = inlined_call_operand.vmem [shape: f32[1,128], index: 3, kind: input, shape index: {}]   ;;  %s426_s4 = inlined_call_operand.vmem [shape: f32[1,128], index: 4, kind: input, shape index: {}]   ;;  %s427_s5 = inlined_call_operand.vmem [shape: bf16[128,128], index: 5, kind: output, shape index: {}]  }
   0x1   :  { %v20_v0 = vld [vmem:[%s422_s1] sm:$0x1]  ;;  %v312_v9 = vld [vmem:[%s424_s0 + $0x8] sm:$0xff]   ;;  %v313_v11 = vld [vmem:[%s424_s0 + $0x10] sm:$0xff]  }
   0x2   :  { %v21_v1 = vld [vmem:[%s423_s2] sm:$0x1]  ;;  %v22_v2 = vmul.f32 %v20_v0, %v20_v0  ;;  %v66_v7 = vshrl.u32 %v65_v6, 7  ;;  %v314_v13 = vld [vmem:[%s424_s0 + $0x18] sm:$0xff]   ;;  %v246_v18 = vunpack.c.l.bf16 %v312_v9  ;;  %v316_v19 = vld [vmem:[%s424_s0 + $0x28] sm:$0xff]   ;;  %v247_v21 = vunpack.c.h.bf16 %v312_v9 }
   0x3   :  { %v241_v8 = vld [vmem:[%s424_s0] sm:$0xff]   ;;  %v250_v22 = vunpack.c.l.bf16 %v313_v11  ;;  %v251_v23 = vunpack.c.h.bf16 %v313_v11  ;;  %v317_v24 = vld [vmem:[%s424_s0 + $0x30] sm:$0xff]   ;;  %v391_v25 = vld [vmem:[%s424_s0 + $0x38] sm:$0xff]   ;;  %v254_v27 = vunpack.c.l.bf16 %v314_v13  ;;  %v255_v28 = vunpack.c.h.bf16 %v314_v13 }
   0x4   :  { %v23_v3 = vsub.f32 %v21_v1, %v22_v2  ;;  %v25_v10 = vld [vmem:[%s425_s3] sm:$0x1]  ;;  %v67_v12 = vsub.s32 0, %v66_v7  ;;  %v242_v16 = vunpack.c.l.bf16 %v241_v8  ;;  %v243_v17 = vunpack.c.h.bf16 %v241_v8 }
   0x5   :  { %v315_v14 = vld [vmem:[%s424_s0 + $0x20] sm:$0xff]   ;;  %v262_v33 = vunpack.c.l.bf16 %v316_v19  ;;  %v263_v34 = vunpack.c.h.bf16 %v316_v19  ;;  %v266_v35 = vunpack.c.l.bf16 %v317_v24  ;;  %v267_v36 = vunpack.c.h.bf16 %v317_v24 }
   0x6   :  { %v24_v4 = vmax.f32 %v23_v3, 0.0  ;;  %v29_v26 = vld [vmem:[%s426_s4] sm:$0x1]  ;;  %v258_v29 = vunpack.c.l.bf16 %v315_v14  ;;  %v259_v30 = vunpack.c.h.bf16 %v315_v14  ;;  %v270_v37 = vunpack.c.l.bf16 %v391_v25 }
   0x7   :  { %v271_v38 = vunpack.c.h.bf16 %v391_v25 }
   0x8   :  { %v26_v5 = vadd.f32 1e-05, %v24_v4 }
   0xa   :  { %326 = vrsqrt.f32 %v26_v5 }
  0x14   :  { %v327_v15 = vpop.eup %326 }
  0x15   :  { %v28_v20 = vmul.f32 %v327_v15, %v25_v10 }
  0x17   :  { %v30_v31 = vmul.f32 %v28_v20, %v20_v0  ;;  %v68_v32 = vrot.slane %v28_v20, %v67_v12 }
  0x19   :  { %v31_v39 = vsub.f32 %v29_v26, %v30_v31  ;;  %v70_v40 = vmul.f32 %v242_v16, %v68_v32  ;;  %v71_v41 = vmul.f32 %v243_v17, %v68_v32  ;;  %v72_v42 = vmul.f32 %v246_v18, %v68_v32 }
  0x1a   :  { %v73_v43 = vmul.f32 %v247_v21, %v68_v32  ;;  %v74_v44 = vmul.f32 %v250_v22, %v68_v32  ;;  %v75_v45 = vmul.f32 %v251_v23, %v68_v32  ;;  %v76_v46 = vmul.f32 %v254_v27, %v68_v32 }
  0x1b   :  { %v90_v47 = vrot.slane %v31_v39, %v67_v12  ;;  %v77_v48 = vmul.f32 %v255_v28, %v68_v32  ;;  %v78_v49 = vmul.f32 %v258_v29, %v68_v32  ;;  %v79_v50 = vmul.f32 %v259_v30, %v68_v32 }
  0x1c   :  { %v80_v51 = vmul.f32 %v262_v33, %v68_v32  ;;  %v81_v52 = vmul.f32 %v263_v34, %v68_v32  ;;  %v82_v53 = vmul.f32 %v266_v35, %v68_v32  ;;  %v83_v54 = vmul.f32 %v267_v36, %v68_v32 }
  0x1d   :  { %v92_v55 = vadd.f32 %v90_v47, %v70_v40  ;;  %v93_v56 = vadd.f32 %v90_v47, %v71_v41  ;;  %v94_v57 = vadd.f32 %v90_v47, %v72_v42  ;;  %v95_v58 = vadd.f32 %v90_v47, %v73_v43 }
  0x1e   :  { %v96_v59 = vadd.f32 %v90_v47, %v74_v44  ;;  %v97_v60 = vadd.f32 %v90_v47, %v75_v45  ;;  %v98_v61 = vadd.f32 %v90_v47, %v76_v46  ;;  %v99_v62 = vadd.f32 %v90_v47, %v77_v48 }
  0x1f   :  { %v108_v63 = vmax.f32 %v92_v55, 0.0  ;;  %v109_v0 = vmax.f32 %v93_v56, 0.0  ;;  %v110_v1 = vmax.f32 %v94_v57, 0.0  ;;  %v111_v2 = vmax.f32 %v95_v58, 0.0 }
  0x20   :  { %v112_v3 = vmax.f32 %v96_v59, 0.0  ;;  %v113_v4 = vmax.f32 %v97_v60, 0.0  ;;  %v114_v5 = vmax.f32 %v98_v61, 0.0  ;;  %v115_v6 = vmax.f32 %v99_v62, 0.0 }
  0x21   :  { %v275_v7 = vpack.c.bf16 %v109_v0, %v108_v63  ;;  %v280_v8 = vpack.c.bf16 %v111_v2, %v110_v1  ;;  %v100_v9 = vadd.f32 %v90_v47, %v78_v49  ;;  %v101_v10 = vadd.f32 %v90_v47, %v79_v50 }
  0x22   :  { %v285_v11 = vpack.c.bf16 %v113_v4, %v112_v3  ;;  %v290_v12 = vpack.c.bf16 %v115_v6, %v114_v5  ;;  %v102_v13 = vadd.f32 %v90_v47, %v80_v51  ;;  %v103_v14 = vadd.f32 %v90_v47, %v81_v52 }
  0x23   :  { %276 = vst [vmem:[%s427_s5] sm:$0xff] %v275_v7   ;;  %319 = vst [vmem:[%s427_s5 + $0x8] sm:$0xff] %v280_v8   ;;  %v116_v15 = vmax.f32 %v100_v9, 0.0  ;;  %v117_v16 = vmax.f32 %v101_v10, 0.0  ;;  %v104_v17 = vadd.f32 %v90_v47, %v82_v53  ;;  %v105_v18 = vadd.f32 %v90_v47, %v83_v54 }
  0x24   :  { %320 = vst [vmem:[%s427_s5 + $0x10] sm:$0xff] %v285_v11   ;;  %321 = vst [vmem:[%s427_s5 + $0x18] sm:$0xff] %v290_v12   ;;  %v118_v19 = vmax.f32 %v102_v13, 0.0  ;;  %v119_v20 = vmax.f32 %v103_v14, 0.0  ;;  %v84_v21 = vmul.f32 %v270_v37, %v68_v32  ;;  %v85_v22 = vmul.f32 %v271_v38, %v68_v32 }
  0x25   :  { %v295_v23 = vpack.c.bf16 %v117_v16, %v116_v15  ;;  %v120_v24 = vmax.f32 %v104_v17, 0.0  ;;  %v121_v25 = vmax.f32 %v105_v18, 0.0 }
  0x26   :  { %v300_v26 = vpack.c.bf16 %v119_v20, %v118_v19  ;;  %v106_v27 = vadd.f32 %v90_v47, %v84_v21  ;;  %v107_v28 = vadd.f32 %v90_v47, %v85_v22 }
  0x27   :  { %322 = vst [vmem:[%s427_s5 + $0x20] sm:$0xff] %v295_v23   ;;  %v305_v29 = vpack.c.bf16 %v121_v25, %v120_v24 }
  0x28   :  { %323 = vst [vmem:[%s427_s5 + $0x28] sm:$0xff] %v300_v26   ;;  %v122_v30 = vmax.f32 %v106_v27, 0.0  ;;  %v123_v31 = vmax.f32 %v107_v28, 0.0 }
  0x29   :  { %324 = vst [vmem:[%s427_s5 + $0x30] sm:$0xff] %v305_v29  }
  0x2a   :  { %v310_v32 = vpack.c.bf16 %v123_v31, %v122_v30 }
  0x2c   :  { %325 = vst [vmem:[%s427_s5 + $0x38] sm:$0xff] %v310_v32  }

// kernel: resnet_block_pallas.6
= control target key start
LH: loop header
LB: loop body
LE: loop exit
PB: predicated region body
PF: predicated region fallthrough
CT: control target
= control target key end

     0   :  { %vm127_vm0 = vcmask 293888   ;;  %vm152_vm1 = vcmask 1041408   ;;  %s702_s1 = inlined_call_operand.vmem [shape: bf16[36,128], index: 1, kind: input, shape index: {}]   ;;  %s703_s0 = inlined_call_operand.vmem [shape: bf16[128,36], index: 0, kind: input, shape index: {}]   ;;  %s704_s2 = inlined_call_operand.vmem [shape: bf16[128,128], index: 2, kind: output, shape index: {0}]   ;;  %s705_s3 = inlined_call_operand.vmem [shape: f32[1,1,128], index: 3, kind: output, shape index: {1}]   ;;  %s706_s4 = inlined_call_operand.vmem [shape: f32[1,1,128], index: 4, kind: output, shape index: {2}]  }
   0x1   :  { %v595_v0 = vld [vmem:[%s702_s1] sm:$0xff]   ;;  %v596_v1 = vld [vmem:[%s702_s1 + $0x8] sm:$0xff]   ;;  %v597_v2 = vld [vmem:[%s702_s1 + $0x10] ss:$0 sps:$4 sm:$0x33]  }
   0x2   :  { %565 = vmatprep.subr.bf16.mxu0 %v595_v0  ;;  %v598_v3 = vld [vmem:[%s703_s0] sm:$0xff]   ;;  %587 = vmatprep.subr.bf16.mxu1 %v595_v0  ;;  %v154_v5 = vsel %vm152_vm1, %v597_v2, 0  ;;  %v599_v6 = vld [vmem:[%s703_s0 + $0x8] sm:$0xff]   ;;  %v600_v8 = vld [vmem:[%s703_s0 + $0x10] sm:$0xff]  }
   0x3   :  { %566 = vmatpush3.bf16.msra.mxu0 %v595_v0  ;;  %590 = vmatpush3.bf16.msra.mxu1 %v595_v0  ;;  %v602_v4 = vld [vmem:[%s703_s0 + $0x20] sm:$0xff]   ;;  %v603_v7 = vld [vmem:[%s703_s0 + $0x28] sm:$0xff]   ;;  %v604_v9 = vld [vmem:[%s703_s0 + $0x30] sm:$0xff]  }
   0x4   :  { %567 = vmatprep.subr.bf16.mxu0 %v596_v1  ;;  %571 = vmatprep.mubr.msk.bf16.mxu0 %vm127_vm0, %v598_v3  ;;  %v601_v10 = vld [vmem:[%s703_s0 + $0x18] sm:$0xff]  }
   0x5   :  { %588 = vmatprep.subr.bf16.mxu1 %v596_v1  ;;  %579 = vmatprep.mubr.msk.bf16.mxu1 %vm127_vm0, %v602_v4  ;;  %v605_v11 = vld [vmem:[%s703_s0 + $0x38] sm:$0xff]  }
   0x7   :  { %568 = vmatpush3.bf16.msra.mxu0 %v596_v1  ;;  %591 = vmatpush3.bf16.msra.mxu1 %v596_v1 }
   0x8   :  { %593 = vmatprep.subr.msk.bf16.mxu0 %vm152_vm1, %v597_v2  ;;  %594 = vmatprep.subr.msk.bf16.mxu1 %vm152_vm1, %v597_v2 }
   0xb   :  { %570 = vmatpush3.bf16.msra.mxu0 %v154_v5  ;;  %592 = vmatpush3.bf16.msra.mxu1 %v154_v5 }
   0xe   :  { %572 = vmatmul.mubr.msk.bf16.vlgmr.msra.gmra.mrb[0].mxu0 %vm127_vm0, %v599_v6  ;;  %580 = vmatmul.mubr.msk.bf16.vlgmr.msra.gmra.mrb[0].mxu1 %vm127_vm0, %v603_v7 }
   0xf   :  { %575 = vmatprep.mubr.msk.bf16.mxu0 %vm127_vm0, %v600_v8  ;;  %583 = vmatprep.mubr.msk.bf16.mxu1 %vm127_vm0, %v604_v9 }
  0x16   :  { %576 = vmatmul.mubr.msk.bf16.gmra.mrb[4].mxu0 %vm127_vm0, %v601_v10  ;;  %584 = vmatmul.mubr.msk.bf16.gmra.mrb[4].mxu1 %vm127_vm0, %v605_v11 }
  0xe1   :  { %v573_v12 = vpop.f32.mrb[0].mxu0  ;;  %v581_v13 = vpop.f32.mrb[0].mxu1 }
  0xe2   :  { %v190_v14 = vpop.f32.mrb[1].mxu0  ;;  %v222_v15 = vpop.f32.mrb[1].mxu1  ;;  %v408_v27 = vmul.f32 %v573_v12, %v573_v12  ;;  %v416_v63 = vmul.f32 %v581_v13, %v581_v13 }
  0xe3   :  { %v574_v16 = vpop.f32.mrb[2].mxu0  ;;  %v582_v17 = vpop.f32.mrb[2].mxu1  ;;  %v406_v18 = vmul.f32 %v190_v14, %v190_v14  ;;  %v414_v57 = vmul.f32 %v222_v15, %v222_v15 }
  0xe4   :  { %v515_v19 = vpack.c.bf16 %v574_v16, %v573_v12  ;;  %v193_v20 = vpop.f32.mrb[3].mxu0  ;;  %v535_v21 = vpack.c.bf16 %v582_v17, %v581_v13  ;;  %v225_v22 = vpop.f32.mrb[3].mxu1  ;;  %v409_v30 = vmul.f32 %v574_v16, %v574_v16  ;;  %v417_v2 = vmul.f32 %v582_v17, %v582_v17 }
  0xe5   :  { %v510_v23 = vpack.c.bf16 %v193_v20, %v190_v14  ;;  %v384_v24 = vadd.f32 %v193_v20, %v190_v14  ;;  %v407_v25 = vmul.f32 %v193_v20, %v193_v20  ;;  %v530_v26 = vpack.c.bf16 %v225_v22, %v222_v15 }
  0xe6   :  { %547 = vst [vmem:[%s704_s2 + $0x8] sm:$0xff] %v515_v19   ;;  %551 = vst [vmem:[%s704_s2 + $0x28] sm:$0xff] %v535_v21   ;;  %v415_v62 = vmul.f32 %v225_v22, %v225_v22 }
  0xe7   :  { %511 = vst [vmem:[%s704_s2] sm:$0xff] %v510_v23   ;;  %v385_v28 = vadd.f32 %v573_v12, %v384_v24  ;;  %v422_v29 = vadd.f32 %v407_v25, %v406_v18  ;;  %550 = vst [vmem:[%s704_s2 + $0x20] sm:$0xff] %v530_v26  }
  0xe9   :  { %v423_v31 = vadd.f32 %v422_v29, %v408_v27  ;;  %v577_v32 = vpop.f32.mrb[4].mxu0  ;;  %v386_v33 = vadd.f32 %v574_v16, %v385_v28  ;;  %v585_v34 = vpop.f32.mrb[4].mxu1 }
  0xea   :  { %v206_v35 = vpop.f32.mrb[5].mxu0  ;;  %v238_v36 = vpop.f32.mrb[5].mxu1  ;;  %v412_v51 = vmul.f32 %v577_v32, %v577_v32  ;;  %v420_v11 = vmul.f32 %v585_v34, %v585_v34 }
  0xeb   :  { %v387_v37 = vadd.f32 %v386_v33, %v206_v35  ;;  %v410_v38 = vmul.f32 %v206_v35, %v206_v35  ;;  %v424_v39 = vadd.f32 %v423_v31, %v409_v30  ;;  %v578_v40 = vpop.f32.mrb[6].mxu0  ;;  %v586_v41 = vpop.f32.mrb[6].mxu1  ;;  %v418_v5 = vmul.f32 %v238_v36, %v238_v36 }
  0xec   :  { %v525_v42 = vpack.c.bf16 %v578_v40, %v577_v32  ;;  %v209_v43 = vpop.f32.mrb[7].mxu0  ;;  %v545_v44 = vpack.c.bf16 %v586_v41, %v585_v34  ;;  %v241_v45 = vpop.f32.mrb[7].mxu1  ;;  %v413_v54 = vmul.f32 %v578_v40, %v578_v40 }
  0xed   :  { %v425_v46 = vadd.f32 %v424_v39, %v410_v38  ;;  %v520_v47 = vpack.c.bf16 %v209_v43, %v206_v35  ;;  %v388_v48 = vadd.f32 %v387_v37, %v209_v43  ;;  %v411_v49 = vmul.f32 %v209_v43, %v209_v43 }
  0xee   :  { %549 = vst [vmem:[%s704_s2 + $0x18] sm:$0xff] %v525_v42   ;;  %553 = vst [vmem:[%s704_s2 + $0x38] sm:$0xff] %v545_v44   ;;  %v540_v50 = vpack.c.bf16 %v241_v45, %v238_v36  ;;  %v419_v10 = vmul.f32 %v241_v45, %v241_v45 }
  0xef   :  { %548 = vst [vmem:[%s704_s2 + $0x10] sm:$0xff] %v520_v47   ;;  %v389_v52 = vadd.f32 %v577_v32, %v388_v48  ;;  %v426_v53 = vadd.f32 %v425_v46, %v411_v49 }
  0xf0   :  { %552 = vst [vmem:[%s704_s2 + $0x30] sm:$0xff] %v540_v50  }
  0xf1   :  { %v427_v55 = vadd.f32 %v426_v53, %v412_v51  ;;  %v390_v56 = vadd.f32 %v578_v40, %v389_v52 }
  0xf3   :  { %v391_v58 = vadd.f32 %v390_v56, %v222_v15  ;;  %v428_v59 = vadd.f32 %v427_v55, %v413_v54  ;;  %v421_v15 = vmul.f32 %v586_v41, %v586_v41 }
  0xf5   :  { %v429_v60 = vadd.f32 %v428_v59, %v414_v57  ;;  %v392_v61 = vadd.f32 %v391_v58, %v225_v22 }
  0xf7   :  { %v393_v0 = vadd.f32 %v581_v13, %v392_v61  ;;  %v430_v1 = vadd.f32 %v429_v60, %v415_v62 }
  0xf9   :  { %v431_v3 = vadd.f32 %v430_v1, %v416_v63  ;;  %v394_v4 = vadd.f32 %v582_v17, %v393_v0 }
  0xfb   :  { %v395_v6 = vadd.f32 %v394_v4, %v238_v36  ;;  %v432_v7 = vadd.f32 %v431_v3, %v417_v2 }
  0xfd   :  { %v433_v8 = vadd.f32 %v432_v7, %v418_v5  ;;  %v396_v9 = vadd.f32 %v395_v6, %v241_v45 }
  0xff   :  { %v397_v12 = vadd.f32 %v585_v34, %v396_v9  ;;  %v434_v14 = vadd.f32 %v433_v8, %v419_v10 }
 0x101   :  { %v398_v16 = vadd.f32 %v586_v41, %v397_v12  ;;  %v435_v18 = vadd.f32 %v434_v14, %v420_v11 }
 0x103   :  { %v399_v19 = vrot.slane %v398_v16, 4  ;;  %v436_v20 = vadd.f32 %v435_v18, %v421_v15 }
 0x105   :  { %v400_v21 = vadd.f32 %v399_v19, %v398_v16  ;;  %v437_v13 = vrot.slane %v436_v20, 4 }
 0x107   :  { %v401_v22 = vrot.slane %v400_v21, 2  ;;  %v438_v23 = vadd.f32 %v437_v13, %v436_v20 }
 0x109   :  { %v402_v24 = vadd.f32 %v401_v22, %v400_v21  ;;  %v439_v17 = vrot.slane %v438_v23, 2 }
 0x10b   :  { %v403_v25 = vrot.slane %v402_v24, 1  ;;  %v440_v26 = vadd.f32 %v439_v17, %v438_v23 }
 0x10d   :  { %v404_v27 = vadd.f32 %v403_v25, %v402_v24  ;;  %v441_v28 = vrot.slane %v440_v26, 1 }
 0x10f   :  { %405 = vst [vmem:[%s705_s3] sm:$0x1] %v404_v27  ;;  %v442_v29 = vadd.f32 %v441_v28, %v440_v26 }
 0x111   :  { %443 = vst [vmem:[%s706_s4] sm:$0x1] %v442_v29 }

// kernel: resnet_block_pallas.11
= control target key start
LH: loop header
LB: loop body
LE: loop exit
PB: predicated region body
PF: predicated region fallthrough
CT: control target
= control target key end

     0   :  { %v68_v6 = vlaneseq  ;;  %s501_s1 = inlined_call_operand.vmem [shape: f32[1,128], index: 1, kind: input, shape index: {}]   ;;  %s502_s2 = inlined_call_operand.vmem [shape: f32[1,128], index: 2, kind: input, shape index: {}]   ;;  %s503_s0 = inlined_call_operand.vmem [shape: bf16[128,128], index: 0, kind: input, shape index: {}]   ;;  %s504_s5 = inlined_call_operand.vmem [shape: bf16[128,128], index: 5, kind: input, shape index: {}]   ;;  %s505_s3 = inlined_call_operand.vmem [shape: f32[1,128], index: 3, kind: input, shape index: {}]   ;;  %s506_s4 = inlined_call_operand.vmem [shape: f32[1,128], index: 4, kind: input, shape index: {}]   ;;  %s507_s6 = inlined_call_operand.vmem [shape: f32[128,128], index: 6, kind: output, shape index: {}]  }
   0x1   :  { %v23_v0 = vld [vmem:[%s501_s1] sm:$0x1]  ;;  %v259_v10 = vld [vmem:[%s503_s0 + $0x8] sm:$0xff]   ;;  %v260_v12 = vld [vmem:[%s503_s0 + $0x10] sm:$0xff]  }
   0x2   :  { %v24_v1 = vld [vmem:[%s502_s2] sm:$0x1]  ;;  %v25_v2 = vmul.f32 %v23_v0, %v23_v0  ;;  %v319_v8 = vshrl.u32 %v68_v6, 7  ;;  %v332_v11 = vld [vmem:[%s504_s5 + $0x8] sm:$0xff]   ;;  %v340_v13 = vld [vmem:[%s504_s5 + $0x10] sm:$0xff]   ;;  %v201_v21 = vunpack.c.l.bf16 %v259_v10  ;;  %v202_v23 = vunpack.c.h.bf16 %v259_v10 }
   0x3   :  { %v196_v7 = vld [vmem:[%s503_s0] sm:$0xff]   ;;  %v261_v18 = vld [vmem:[%s503_s0 + $0x18] sm:$0xff]   ;;  %v233_v22 = vunpack.c.l.bf16 %v332_v11  ;;  %v234_v27 = vunpack.c.h.bf16 %v332_v11  ;;  %v205_v28 = vunpack.c.l.bf16 %v260_v12  ;;  %v237_v29 = vunpack.c.l.bf16 %v340_v13  ;;  %v263_v31 = vld [vmem:[%s503_s0 + $0x28] sm:$0xff]  }
   0x4   :  { %v26_v3 = vsub.f32 %v24_v1, %v25_v2  ;;  %v324_v9 = vld [vmem:[%s504_s5] sm:$0xff]   ;;  %v197_v14 = vunpack.c.l.bf16 %v196_v7  ;;  %v198_v16 = vunpack.c.h.bf16 %v196_v7  ;;  %v350_v19 = vld [vmem:[%s504_s5 + $0x18] sm:$0xff]   ;;  %v70_v20 = vsub.s32 0, %v319_v8  ;;  %v373_v32 = vld [vmem:[%s504_s5 + $0x28] sm:$0xff]  }
   0x5   :  { %v229_v15 = vunpack.c.l.bf16 %v324_v9  ;;  %v230_v17 = vunpack.c.h.bf16 %v324_v9  ;;  %v262_v24 = vld [vmem:[%s503_s0 + $0x20] sm:$0xff]   ;;  %v206_v30 = vunpack.c.h.bf16 %v260_v12  ;;  %v238_v33 = vunpack.c.h.bf16 %v340_v13  ;;  %v264_v37 = vld [vmem:[%s503_s0 + $0x30] sm:$0xff]   ;;  %v392_v48 = vld [vmem:[%s503_s0 + $0x38] sm:$0xff]  }
   0x6   :  { %v27_v4 = vmax.f32 %v26_v3, 0.0  ;;  %v360_v25 = vld [vmem:[%s504_s5 + $0x20] sm:$0xff]   ;;  %v209_v34 = vunpack.c.l.bf16 %v261_v18  ;;  %v241_v35 = vunpack.c.l.bf16 %v350_v19  ;;  %v210_v36 = vunpack.c.h.bf16 %v261_v18  ;;  %v383_v38 = vld [vmem:[%s504_s5 + $0x30] sm:$0xff]   ;;  %v397_v49 = vld [vmem:[%s504_s5 + $0x38] sm:$0xff]  }
   0x7   :  { %v28_v26 = vld [vmem:[%s505_s3] sm:$0x1]  ;;  %v242_v40 = vunpack.c.h.bf16 %v350_v19  ;;  %v213_v41 = vunpack.c.l.bf16 %v262_v24  ;;  %v245_v42 = vunpack.c.l.bf16 %v360_v25  ;;  %v214_v43 = vunpack.c.h.bf16 %v262_v24 }
   0x8   :  { %v29_v5 = vadd.f32 1e-05, %v27_v4  ;;  %v246_v45 = vunpack.c.h.bf16 %v360_v25  ;;  %v217_v46 = vunpack.c.l.bf16 %v263_v31  ;;  %v249_v47 = vunpack.c.l.bf16 %v373_v32  ;;  %v32_v50 = vld [vmem:[%s506_s4] sm:$0x1] }
   0x9   :  { %v218_v51 = vunpack.c.h.bf16 %v263_v31  ;;  %v250_v52 = vunpack.c.h.bf16 %v373_v32  ;;  %v221_v53 = vunpack.c.l.bf16 %v264_v37  ;;  %v253_v54 = vunpack.c.l.bf16 %v383_v38 }
   0xa   :  { %273 = vrsqrt.f32 %v29_v5  ;;  %v222_v57 = vunpack.c.h.bf16 %v264_v37  ;;  %v254_v58 = vunpack.c.h.bf16 %v383_v38  ;;  %v225_v59 = vunpack.c.l.bf16 %v392_v48 }
   0xb   :  { %v257_v60 = vunpack.c.l.bf16 %v397_v49  ;;  %v226_v61 = vunpack.c.h.bf16 %v392_v48  ;;  %v258_v62 = vunpack.c.h.bf16 %v397_v49 }
  0x14   :  { %v274_v39 = vpop.eup %273 }
  0x15   :  { %v31_v44 = vmul.f32 %v274_v39, %v28_v26 }
  0x17   :  { %v33_v55 = vmul.f32 %v31_v44, %v23_v0  ;;  %v404_v56 = vrot.slane %v31_v44, %v70_v20 }
  0x19   :  { %v34_v63 = vsub.f32 %v32_v50, %v33_v55  ;;  %v73_v1 = vmul.f32 %v197_v14, %v404_v56  ;;  %v74_v2 = vmul.f32 %v198_v16, %v404_v56  ;;  %v75_v0 = vmul.f32 %v201_v21, %v404_v56 }
  0x1a   :  { %v76_v3 = vmul.f32 %v202_v23, %v404_v56  ;;  %v77_v4 = vmul.f32 %v205_v28, %v404_v56  ;;  %v78_v5 = vmul.f32 %v206_v30, %v404_v56  ;;  %v79_v6 = vmul.f32 %v209_v34, %v404_v56 }
  0x1b   :  { %v93_v7 = vrot.slane %v34_v63, %v70_v20  ;;  %v80_v8 = vmul.f32 %v210_v36, %v404_v56  ;;  %v81_v10 = vmul.f32 %v213_v41, %v404_v56  ;;  %v82_v12 = vmul.f32 %v214_v43, %v404_v56 }
  0x1c   :  { %v83_v14 = vmul.f32 %v217_v46, %v404_v56  ;;  %v84_v16 = vmul.f32 %v218_v51, %v404_v56  ;;  %v85_v18 = vmul.f32 %v221_v53, %v404_v56  ;;  %v86_v19 = vmul.f32 %v222_v57, %v404_v56 }
  0x1d   :  { %v95_v21 = vadd.f32 %v93_v7, %v73_v1  ;;  %v96_v23 = vadd.f32 %v93_v7, %v74_v2  ;;  %v97_v24 = vadd.f32 %v93_v7, %v75_v0  ;;  %v98_v26 = vadd.f32 %v93_v7, %v76_v3 }
  0x1e   :  { %v99_v28 = vadd.f32 %v93_v7, %v77_v4  ;;  %v100_v20 = vadd.f32 %v93_v7, %v78_v5  ;;  %v101_v30 = vadd.f32 %v93_v7, %v79_v6  ;;  %v102_v31 = vadd.f32 %v93_v7, %v80_v8 }
  0x1f   :  { %v143_v34 = vadd.f32 %v229_v15, %v95_v21  ;;  %v144_v36 = vadd.f32 %v230_v17, %v96_v23  ;;  %v145_v37 = vadd.f32 %v233_v22, %v97_v24  ;;  %v146_v39 = vadd.f32 %v234_v27, %v98_v26 }
  0x20   :  { %v147_v41 = vadd.f32 %v237_v29, %v99_v28  ;;  %v148_v43 = vadd.f32 %v238_v33, %v100_v20  ;;  %v149_v44 = vadd.f32 %v241_v35, %v101_v30  ;;  %v150_v46 = vadd.f32 %v242_v40, %v102_v31 }
  0x21   :  { %v159_v48 = vmax.f32 %v143_v34, 0.0  ;;  %v160_v50 = vmax.f32 %v144_v36, 0.0  ;;  %v161_v51 = vmax.f32 %v145_v37, 0.0  ;;  %v162_v53 = vmax.f32 %v146_v39, 0.0 }
  0x22   :  { %v163_v15 = vmax.f32 %v147_v41, 0.0  ;;  %v164_v55 = vmax.f32 %v148_v43, 0.0  ;;  %v165_v9 = vmax.f32 %v149_v44, 0.0  ;;  %v166_v17 = vmax.f32 %v150_v46, 0.0 }
  0x23   :  { %175 = vst [vmem:[%s507_s6] sm:$0xff] %v159_v48  ;;  %176 = vst [vmem:[%s507_s6 + $0x8] sm:$0xff] %v160_v50  ;;  %v103_v11 = vadd.f32 %v93_v7, %v81_v10  ;;  %v104_v13 = vadd.f32 %v93_v7, %v82_v12  ;;  %v105_v22 = vadd.f32 %v93_v7, %v83_v14 }
  0x24   :  { %177 = vst [vmem:[%s507_s6 + $0x10] sm:$0xff] %v161_v51  ;;  %178 = vst [vmem:[%s507_s6 + $0x18] sm:$0xff] %v162_v53  ;;  %v106_v27 = vadd.f32 %v93_v7, %v84_v16  ;;  %v107_v29 = vadd.f32 %v93_v7, %v85_v18  ;;  %v108_v33 = vadd.f32 %v93_v7, %v86_v19 }
  0x25   :  { %179 = vst [vmem:[%s507_s6 + $0x20] sm:$0xff] %v163_v15  ;;  %180 = vst [vmem:[%s507_s6 + $0x28] sm:$0xff] %v164_v55  ;;  %v87_v35 = vmul.f32 %v225_v59, %v404_v56  ;;  %v88_v40 = vmul.f32 %v226_v61, %v404_v56  ;;  %v151_v57 = vadd.f32 %v245_v42, %v103_v11 }
  0x26   :  { %181 = vst [vmem:[%s507_s6 + $0x30] sm:$0xff] %v165_v9  ;;  %182 = vst [vmem:[%s507_s6 + $0x38] sm:$0xff] %v166_v17  ;;  %v152_v63 = vadd.f32 %v246_v45, %v104_v13  ;;  %v153_v1 = vadd.f32 %v249_v47, %v105_v22  ;;  %v154_v2 = vadd.f32 %v250_v52, %v106_v27 }
  0x27   :  { %v155_v0 = vadd.f32 %v253_v54, %v107_v29  ;;  %v156_v59 = vadd.f32 %v254_v58, %v108_v33  ;;  %v109_v3 = vadd.f32 %v93_v7, %v87_v35  ;;  %v110_v56 = vadd.f32 %v93_v7, %v88_v40 }
  0x28   :  { %v167_v61 = vmax.f32 %v151_v57, 0.0  ;;  %v168_v4 = vmax.f32 %v152_v63, 0.0  ;;  %v169_v42 = vmax.f32 %v153_v1, 0.0  ;;  %v170_v5 = vmax.f32 %v154_v2, 0.0 }
  0x29   :  { %v171_v25 = vmax.f32 %v155_v0, 0.0  ;;  %v172_v45 = vmax.f32 %v156_v59, 0.0  ;;  %v157_v47 = vadd.f32 %v257_v60, %v109_v3  ;;  %v158_v32 = vadd.f32 %v258_v62, %v110_v56 }
  0x2a   :  { %183 = vst [vmem:[%s507_s6 + $0x40] sm:$0xff] %v167_v61  ;;  %184 = vst [vmem:[%s507_s6 + $0x48] sm:$0xff] %v168_v4 }
  0x2b   :  { %185 = vst [vmem:[%s507_s6 + $0x50] sm:$0xff] %v169_v42  ;;  %186 = vst [vmem:[%s507_s6 + $0x58] sm:$0xff] %v170_v5  ;;  %v173_v38 = vmax.f32 %v157_v47, 0.0  ;;  %v174_v49 = vmax.f32 %v158_v32, 0.0 }
  0x2c   :  { %187 = vst [vmem:[%s507_s6 + $0x60] sm:$0xff] %v171_v25  ;;  %188 = vst [vmem:[%s507_s6 + $0x68] sm:$0xff] %v172_v45 }
  0x2d   :  { %189 = vst [vmem:[%s507_s6 + $0x70] sm:$0xff] %v173_v38  ;;  %190 = vst [vmem:[%s507_s6 + $0x78] sm:$0xff] %v174_v49 }

// kernel: resnet_block_pallas.10
= control target key start
LH: loop header
LB: loop body
LE: loop exit
PB: predicated region body
PF: predicated region fallthrough
CT: control target
= control target key end

     0   :  { %vm143_vm0 = vcmask 588800   ;;  %vm168_vm1 = vcmask 1043456   ;;  %s738_s1 = inlined_call_operand.vmem [shape: bf16[72,128], index: 1, kind: input, shape index: {}]   ;;  %s739_s0 = inlined_call_operand.vmem [shape: bf16[128,72], index: 0, kind: input, shape index: {}]   ;;  %s740_s2 = inlined_call_operand.vmem [shape: bf16[128,128], index: 2, kind: output, shape index: {0}]   ;;  %s741_s3 = inlined_call_operand.vmem [shape: f32[1,1,128], index: 3, kind: output, shape index: {1}]   ;;  %s742_s4 = inlined_call_operand.vmem [shape: f32[1,1,128], index: 4, kind: output, shape index: {2}]  }
   0x1   :  { %v623_v0 = vld [vmem:[%s738_s1] sm:$0xff]   ;;  %v624_v1 = vld [vmem:[%s738_s1 + $0x8] sm:$0xff]   ;;  %v625_v2 = vld [vmem:[%s738_s1 + $0x10] sm:$0xff]  }
   0x2   :  { %585 = vmatprep.subr.bf16.mxu0 %v623_v0  ;;  %611 = vmatprep.subr.bf16.mxu1 %v623_v0  ;;  %v628_v3 = vld [vmem:[%s739_s0] sm:$0xff]   ;;  %v626_v4 = vld [vmem:[%s738_s1 + $0x18] sm:$0xff]   ;;  %v629_v8 = vld [vmem:[%s739_s0 + $0x8] sm:$0xff]  }
   0x3   :  { %586 = vmatpush3.bf16.msra.mxu0 %v623_v0  ;;  %616 = vmatpush3.bf16.msra.mxu1 %v623_v0  ;;  %v632_v5 = vld [vmem:[%s739_s0 + $0x20] sm:$0xff]   ;;  %v633_v9 = vld [vmem:[%s739_s0 + $0x28] sm:$0xff]   ;;  %v630_v10 = vld [vmem:[%s739_s0 + $0x10] sm:$0xff]  }
   0x4   :  { %587 = vmatprep.subr.bf16.mxu0 %v624_v1  ;;  %612 = vmatprep.subr.bf16.mxu1 %v624_v1  ;;  %v627_v6 = vld [vmem:[%s738_s1 + $0x20] ss:$0 sps:$4 sm:$0xff]   ;;  %v634_v11 = vld [vmem:[%s739_s0 + $0x30] sm:$0xff]   ;;  %v631_v12 = vld [vmem:[%s739_s0 + $0x18] sm:$0xff]  }
   0x5   :  { %595 = vmatprep.mubr.msk.bf16.mxu0 %vm143_vm0, %v628_v3  ;;  %603 = vmatprep.mubr.msk.bf16.mxu1 %vm143_vm0, %v632_v5  ;;  %v170_v7 = vsel %vm168_vm1, %v627_v6, 0  ;;  %v635_v13 = vld [vmem:[%s739_s0 + $0x38] sm:$0xff]  }
   0x7   :  { %588 = vmatpush3.bf16.msra.mxu0 %v624_v1  ;;  %617 = vmatpush3.bf16.msra.mxu1 %v624_v1 }
   0x8   :  { %589 = vmatprep.subr.bf16.mxu0 %v625_v2  ;;  %613 = vmatprep.subr.bf16.mxu1 %v625_v2 }
   0xb   :  { %590 = vmatpush3.bf16.msra.mxu0 %v625_v2  ;;  %618 = vmatpush3.bf16.msra.mxu1 %v625_v2 }
   0xc   :  { %591 = vmatprep.subr.bf16.mxu0 %v626_v4  ;;  %614 = vmatprep.subr.bf16.mxu1 %v626_v4 }
   0xf   :  { %592 = vmatpush3.bf16.msra.mxu0 %v626_v4  ;;  %619 = vmatpush3.bf16.msra.mxu1 %v626_v4 }
  0x10   :  { %621 = vmatprep.subr.msk.bf16.mxu0 %vm168_vm1, %v627_v6  ;;  %622 = vmatprep.subr.msk.bf16.mxu1 %vm168_vm1, %v627_v6 }
  0x13   :  { %594 = vmatpush3.bf16.msra.mxu0 %v170_v7  ;;  %620 = vmatpush3.bf16.msra.mxu1 %v170_v7 }
  0x16   :  { %596 = vmatmul.mubr.msk.bf16.vlgmr.msra.gmra.mrb[0].mxu0 %vm143_vm0, %v629_v8  ;;  %604 = vmatmul.mubr.msk.bf16.vlgmr.msra.gmra.mrb[0].mxu1 %vm143_vm0, %v633_v9 }
  0x17   :  { %599 = vmatprep.mubr.msk.bf16.mxu0 %vm143_vm0, %v630_v10  ;;  %607 = vmatprep.mubr.msk.bf16.mxu1 %vm143_vm0, %v634_v11 }
  0x1e   :  { %600 = vmatmul.mubr.msk.bf16.gmra.mrb[4].mxu0 %vm143_vm0, %v631_v12  ;;  %608 = vmatmul.mubr.msk.bf16.gmra.mrb[4].mxu1 %vm143_vm0, %v635_v13 }
  0xe9   :  { %v597_v14 = vpop.f32.mrb[0].mxu0  ;;  %v605_v15 = vpop.f32.mrb[0].mxu1 }
  0xea   :  { %v206_v16 = vpop.f32.mrb[1].mxu0  ;;  %v238_v17 = vpop.f32.mrb[1].mxu1  ;;  %v424_v29 = vmul.f32 %v597_v14, %v597_v14  ;;  %v432_v1 = vmul.f32 %v605_v15, %v605_v15 }
  0xeb   :  { %v598_v18 = vpop.f32.mrb[2].mxu0  ;;  %v606_v19 = vpop.f32.mrb[2].mxu1  ;;  %v422_v20 = vmul.f32 %v206_v16, %v206_v16  ;;  %v430_v59 = vmul.f32 %v238_v17, %v238_v17 }
  0xec   :  { %v533_v21 = vpack.c.bf16 %v598_v18, %v597_v14  ;;  %v209_v22 = vpop.f32.mrb[3].mxu0  ;;  %v553_v23 = vpack.c.bf16 %v606_v19, %v605_v15  ;;  %v241_v24 = vpop.f32.mrb[3].mxu1  ;;  %v425_v32 = vmul.f32 %v598_v18, %v598_v18  ;;  %v433_v4 = vmul.f32 %v606_v19, %v606_v19 }
  0xed   :  { %v528_v25 = vpack.c.bf16 %v209_v22, %v206_v16  ;;  %v400_v26 = vadd.f32 %v209_v22, %v206_v16  ;;  %v423_v27 = vmul.f32 %v209_v22, %v209_v22  ;;  %v548_v28 = vpack.c.bf16 %v241_v24, %v238_v17 }
  0xee   :  { %565 = vst [vmem:[%s740_s2 + $0x8] sm:$0xff] %v533_v21   ;;  %569 = vst [vmem:[%s740_s2 + $0x28] sm:$0xff] %v553_v23   ;;  %v431_v0 = vmul.f32 %v241_v24, %v241_v24 }
  0xef   :  { %529 = vst [vmem:[%s740_s2] sm:$0xff] %v528_v25   ;;  %v401_v30 = vadd.f32 %v597_v14, %v400_v26  ;;  %v438_v31 = vadd.f32 %v423_v27, %v422_v20  ;;  %568 = vst [vmem:[%s740_s2 + $0x20] sm:$0xff] %v548_v28  }
  0xf1   :  { %v439_v33 = vadd.f32 %v438_v31, %v424_v29  ;;  %v601_v34 = vpop.f32.mrb[4].mxu0  ;;  %v402_v35 = vadd.f32 %v598_v18, %v401_v30  ;;  %v609_v36 = vpop.f32.mrb[4].mxu1 }
  0xf2   :  { %v222_v37 = vpop.f32.mrb[5].mxu0  ;;  %v254_v38 = vpop.f32.mrb[5].mxu1  ;;  %v428_v53 = vmul.f32 %v601_v34, %v601_v34  ;;  %v436_v13 = vmul.f32 %v609_v36, %v609_v36 }
  0xf3   :  { %v403_v39 = vadd.f32 %v402_v35, %v222_v37  ;;  %v426_v40 = vmul.f32 %v222_v37, %v222_v37  ;;  %v440_v41 = vadd.f32 %v439_v33, %v425_v32  ;;  %v602_v42 = vpop.f32.mrb[6].mxu0  ;;  %v610_v43 = vpop.f32.mrb[6].mxu1  ;;  %v434_v7 = vmul.f32 %v254_v38, %v254_v38 }
  0xf4   :  { %v543_v44 = vpack.c.bf16 %v602_v42, %v601_v34  ;;  %v225_v45 = vpop.f32.mrb[7].mxu0  ;;  %v563_v46 = vpack.c.bf16 %v610_v43, %v609_v36  ;;  %v257_v47 = vpop.f32.mrb[7].mxu1  ;;  %v429_v56 = vmul.f32 %v602_v42, %v602_v42 }
  0xf5   :  { %v441_v48 = vadd.f32 %v440_v41, %v426_v40  ;;  %v538_v49 = vpack.c.bf16 %v225_v45, %v222_v37  ;;  %v404_v50 = vadd.f32 %v403_v39, %v225_v45  ;;  %v427_v51 = vmul.f32 %v225_v45, %v225_v45 }
  0xf6   :  { %567 = vst [vmem:[%s740_s2 + $0x18] sm:$0xff] %v543_v44   ;;  %571 = vst [vmem:[%s740_s2 + $0x38] sm:$0xff] %v563_v46   ;;  %v558_v52 = vpack.c.bf16 %v257_v47, %v254_v38  ;;  %v435_v12 = vmul.f32 %v257_v47, %v257_v47 }
  0xf7   :  { %566 = vst [vmem:[%s740_s2 + $0x10] sm:$0xff] %v538_v49   ;;  %v405_v54 = vadd.f32 %v601_v34, %v404_v50  ;;  %v442_v55 = vadd.f32 %v441_v48, %v427_v51 }
  0xf8   :  { %570 = vst [vmem:[%s740_s2 + $0x30] sm:$0xff] %v558_v52  }
  0xf9   :  { %v443_v57 = vadd.f32 %v442_v55, %v428_v53  ;;  %v406_v58 = vadd.f32 %v602_v42, %v405_v54 }
  0xfb   :  { %v407_v60 = vadd.f32 %v406_v58, %v238_v17  ;;  %v444_v61 = vadd.f32 %v443_v57, %v429_v56  ;;  %v437_v17 = vmul.f32 %v610_v43, %v610_v43 }
  0xfd   :  { %v445_v62 = vadd.f32 %v444_v61, %v430_v59  ;;  %v408_v63 = vadd.f32 %v407_v60, %v241_v24 }
  0xff   :  { %v409_v2 = vadd.f32 %v605_v15, %v408_v63  ;;  %v446_v3 = vadd.f32 %v445_v62, %v431_v0 }
 0x101   :  { %v447_v5 = vadd.f32 %v446_v3, %v432_v1  ;;  %v410_v6 = vadd.f32 %v606_v19, %v409_v2 }
 0x103   :  { %v411_v8 = vadd.f32 %v410_v6, %v254_v38  ;;  %v448_v9 = vadd.f32 %v447_v5, %v433_v4 }
 0x105   :  { %v449_v10 = vadd.f32 %v448_v9, %v434_v7  ;;  %v412_v11 = vadd.f32 %v411_v8, %v257_v47 }
 0x107   :  { %v413_v14 = vadd.f32 %v609_v36, %v412_v11  ;;  %v450_v16 = vadd.f32 %v449_v10, %v435_v12 }
 0x109   :  { %v414_v18 = vadd.f32 %v610_v43, %v413_v14  ;;  %v451_v20 = vadd.f32 %v450_v16, %v436_v13 }
 0x10b   :  { %v415_v21 = vrot.slane %v414_v18, 4  ;;  %v452_v22 = vadd.f32 %v451_v20, %v437_v17 }
 0x10d   :  { %v416_v23 = vadd.f32 %v415_v21, %v414_v18  ;;  %v453_v15 = vrot.slane %v452_v22, 4 }
 0x10f   :  { %v417_v24 = vrot.slane %v416_v23, 2  ;;  %v454_v25 = vadd.f32 %v453_v15, %v452_v22 }
 0x111   :  { %v418_v26 = vadd.f32 %v417_v24, %v416_v23  ;;  %v455_v19 = vrot.slane %v454_v25, 2 }
 0x113   :  { %v419_v27 = vrot.slane %v418_v26, 1  ;;  %v456_v28 = vadd.f32 %v455_v19, %v454_v25 }
 0x115   :  { %v420_v29 = vadd.f32 %v419_v27, %v418_v26  ;;  %v457_v30 = vrot.slane %v456_v28, 1 }
 0x117   :  { %421 = vst [vmem:[%s741_s3] sm:$0x1] %v420_v29  ;;  %v458_v31 = vadd.f32 %v457_v30, %v456_v28 }
 0x119   :  { %459 = vst [vmem:[%s742_s4] sm:$0x1] %v458_v31 }

// kernel: resnet_block_pallas.8
= control target key start
LH: loop header
LB: loop body
LE: loop exit
PB: predicated region body
PF: predicated region fallthrough
CT: control target
= control target key end

     0   :  { %vm133_vm0 = vcmask 1041408   ;;  %vm108_vm1 = vcmask 31744   ;;  %s661_s1 = inlined_call_operand.vmem [shape: bf16[4,128], index: 1, kind: input, shape index: {}]   ;;  %s662_s0 = inlined_call_operand.vmem [shape: bf16[128,4], index: 0, kind: input, shape index: {}]   ;;  %s663_s2 = inlined_call_operand.vmem [shape: bf16[128,128], index: 2, kind: output, shape index: {0}]   ;;  %s664_s3 = inlined_call_operand.vmem [shape: f32[1,1,128], index: 3, kind: output, shape index: {1}]   ;;  %s665_s4 = inlined_call_operand.vmem [shape: f32[1,1,128], index: 4, kind: output, shape index: {2}]  }
   0x1   :  { %v67_v0 = vld [vmem:[%s661_s1] sm:$0x3]  ;;  %v564_v3 = vld [vmem:[%s662_s0 + $0x8] sm:$0xff]   ;;  %v565_v4 = vld [vmem:[%s662_s0 + $0x10] sm:$0xff]  }
   0x2   :  { %561 = vmatprep.subr.msk.bf16.mxu0 %vm133_vm0, %v67_v0  ;;  %v135_v1 = vsel %vm133_vm0, %v67_v0, 0  ;;  %v563_v2 = vld [vmem:[%s662_s0] sm:$0xff]   ;;  %562 = vmatprep.subr.msk.bf16.mxu1 %vm133_vm0, %v67_v0  ;;  %v568_v6 = vld [vmem:[%s662_s0 + $0x28] sm:$0xff]   ;;  %v569_v7 = vld [vmem:[%s662_s0 + $0x30] sm:$0xff]  }
   0x3   :  { %542 = vmatpush3.bf16.msra.mxu0 %v135_v1  ;;  %560 = vmatpush3.bf16.msra.mxu1 %v135_v1  ;;  %v567_v5 = vld [vmem:[%s662_s0 + $0x20] sm:$0xff]   ;;  %v566_v8 = vld [vmem:[%s662_s0 + $0x18] sm:$0xff]  }
   0x4   :  { %543 = vmatprep.mubr.msk.bf16.mxu0 %vm108_vm1, %v563_v2  ;;  %551 = vmatprep.mubr.msk.bf16.mxu1 %vm108_vm1, %v567_v5  ;;  %v570_v9 = vld [vmem:[%s662_s0 + $0x38] sm:$0xff]  }
   0x6   :  { %544 = vmatmul.mubr.msk.bf16.vlgmr.msra.gmra.mrb[0].mxu0 %vm108_vm1, %v564_v3  ;;  %552 = vmatmul.mubr.msk.bf16.vlgmr.msra.gmra.mrb[0].mxu1 %vm108_vm1, %v568_v6 }
   0x7   :  { %547 = vmatprep.mubr.msk.bf16.mxu0 %vm108_vm1, %v565_v4  ;;  %555 = vmatprep.mubr.msk.bf16.mxu1 %vm108_vm1, %v569_v7 }
   0xe   :  { %548 = vmatmul.mubr.msk.bf16.gmra.mrb[4].mxu0 %vm108_vm1, %v566_v8  ;;  %556 = vmatmul.mubr.msk.bf16.gmra.mrb[4].mxu1 %vm108_vm1, %v570_v9 }
  0xd9   :  { %v545_v10 = vpop.f32.mrb[0].mxu0  ;;  %v553_v15 = vpop.f32.mrb[0].mxu1 }
  0xda   :  { %v171_v11 = vpop.f32.mrb[1].mxu0  ;;  %v203_v20 = vpop.f32.mrb[1].mxu1  ;;  %v389_v22 = vmul.f32 %v545_v10, %v545_v10  ;;  %v397_v61 = vmul.f32 %v553_v15, %v553_v15 }
  0xdb   :  { %v546_v12 = vpop.f32.mrb[2].mxu0  ;;  %v387_v16 = vmul.f32 %v171_v11, %v171_v11  ;;  %v554_v21 = vpop.f32.mrb[2].mxu1  ;;  %v395_v55 = vmul.f32 %v203_v20, %v203_v20 }
  0xdc   :  { %v493_v13 = vpack.c.bf16 %v546_v12, %v545_v10  ;;  %v174_v14 = vpop.f32.mrb[3].mxu0  ;;  %v513_v25 = vpack.c.bf16 %v554_v21, %v553_v15  ;;  %v206_v26 = vpop.f32.mrb[3].mxu1  ;;  %v390_v28 = vmul.f32 %v546_v12, %v546_v12  ;;  %v398_v0 = vmul.f32 %v554_v21, %v554_v21 }
  0xdd   :  { %v488_v17 = vpack.c.bf16 %v174_v14, %v171_v11  ;;  %v365_v18 = vadd.f32 %v174_v14, %v171_v11  ;;  %v388_v19 = vmul.f32 %v174_v14, %v174_v14  ;;  %v508_v27 = vpack.c.bf16 %v206_v26, %v203_v20 }
  0xde   :  { %525 = vst [vmem:[%s663_s2 + $0x8] sm:$0xff] %v493_v13   ;;  %529 = vst [vmem:[%s663_s2 + $0x28] sm:$0xff] %v513_v25   ;;  %v396_v60 = vmul.f32 %v206_v26, %v206_v26 }
  0xdf   :  { %489 = vst [vmem:[%s663_s2] sm:$0xff] %v488_v17   ;;  %v366_v23 = vadd.f32 %v545_v10, %v365_v18  ;;  %v403_v24 = vadd.f32 %v388_v19, %v387_v16  ;;  %528 = vst [vmem:[%s663_s2 + $0x20] sm:$0xff] %v508_v27  }
  0xe1   :  { %v404_v29 = vadd.f32 %v403_v24, %v389_v22  ;;  %v549_v30 = vpop.f32.mrb[4].mxu0  ;;  %v367_v31 = vadd.f32 %v546_v12, %v366_v23  ;;  %v557_v39 = vpop.f32.mrb[4].mxu1 }
  0xe2   :  { %v187_v32 = vpop.f32.mrb[5].mxu0  ;;  %v219_v44 = vpop.f32.mrb[5].mxu1  ;;  %v393_v46 = vmul.f32 %v549_v30, %v549_v30  ;;  %v401_v9 = vmul.f32 %v557_v39, %v557_v39 }
  0xe3   :  { %v368_v33 = vadd.f32 %v367_v31, %v187_v32  ;;  %v391_v34 = vmul.f32 %v187_v32, %v187_v32  ;;  %v405_v35 = vadd.f32 %v404_v29, %v390_v28  ;;  %v550_v36 = vpop.f32.mrb[6].mxu0  ;;  %v558_v45 = vpop.f32.mrb[6].mxu1  ;;  %v399_v3 = vmul.f32 %v219_v44, %v219_v44 }
  0xe4   :  { %v503_v37 = vpack.c.bf16 %v550_v36, %v549_v30  ;;  %v190_v38 = vpop.f32.mrb[7].mxu0  ;;  %v523_v49 = vpack.c.bf16 %v558_v45, %v557_v39  ;;  %v222_v50 = vpop.f32.mrb[7].mxu1  ;;  %v394_v52 = vmul.f32 %v550_v36, %v550_v36  ;;  %v402_v12 = vmul.f32 %v558_v45, %v558_v45 }
  0xe5   :  { %v406_v40 = vadd.f32 %v405_v35, %v391_v34  ;;  %v498_v41 = vpack.c.bf16 %v190_v38, %v187_v32  ;;  %v369_v42 = vadd.f32 %v368_v33, %v190_v38  ;;  %v392_v43 = vmul.f32 %v190_v38, %v190_v38 }
  0xe6   :  { %527 = vst [vmem:[%s663_s2 + $0x18] sm:$0xff] %v503_v37   ;;  %v518_v51 = vpack.c.bf16 %v222_v50, %v219_v44  ;;  %531 = vst [vmem:[%s663_s2 + $0x38] sm:$0xff] %v523_v49   ;;  %v400_v8 = vmul.f32 %v222_v50, %v222_v50 }
  0xe7   :  { %526 = vst [vmem:[%s663_s2 + $0x10] sm:$0xff] %v498_v41   ;;  %v370_v47 = vadd.f32 %v549_v30, %v369_v42  ;;  %v407_v48 = vadd.f32 %v406_v40, %v392_v43 }
  0xe8   :  { %530 = vst [vmem:[%s663_s2 + $0x30] sm:$0xff] %v518_v51  }
  0xe9   :  { %v408_v53 = vadd.f32 %v407_v48, %v393_v46  ;;  %v371_v54 = vadd.f32 %v550_v36, %v370_v47 }
  0xeb   :  { %v372_v56 = vadd.f32 %v371_v54, %v203_v20  ;;  %v409_v57 = vadd.f32 %v408_v53, %v394_v52 }
  0xed   :  { %v410_v58 = vadd.f32 %v409_v57, %v395_v55  ;;  %v373_v59 = vadd.f32 %v372_v56, %v206_v26 }
  0xef   :  { %v374_v62 = vadd.f32 %v553_v15, %v373_v59  ;;  %v411_v63 = vadd.f32 %v410_v58, %v396_v60 }
  0xf1   :  { %v412_v1 = vadd.f32 %v411_v63, %v397_v61  ;;  %v375_v2 = vadd.f32 %v554_v21, %v374_v62 }
  0xf3   :  { %v376_v4 = vadd.f32 %v375_v2, %v219_v44  ;;  %v413_v5 = vadd.f32 %v412_v1, %v398_v0 }
  0xf5   :  { %v414_v6 = vadd.f32 %v413_v5, %v399_v3  ;;  %v377_v7 = vadd.f32 %v376_v4, %v222_v50 }
  0xf7   :  { %v378_v10 = vadd.f32 %v557_v39, %v377_v7  ;;  %v415_v11 = vadd.f32 %v414_v6, %v400_v8 }
  0xf9   :  { %v379_v13 = vadd.f32 %v558_v45, %v378_v10  ;;  %v416_v14 = vadd.f32 %v415_v11, %v401_v9 }
  0xfb   :  { %v380_v16 = vrot.slane %v379_v13, 4  ;;  %v417_v17 = vadd.f32 %v416_v14, %v402_v12 }
  0xfd   :  { %v381_v18 = vadd.f32 %v380_v16, %v379_v13  ;;  %v418_v15 = vrot.slane %v417_v17, 4 }
  0xff   :  { %v382_v19 = vrot.slane %v381_v18, 2  ;;  %v419_v20 = vadd.f32 %v418_v15, %v417_v17 }
 0x101   :  { %v383_v22 = vadd.f32 %v382_v19, %v381_v18  ;;  %v420_v21 = vrot.slane %v419_v20, 2 }
 0x103   :  { %v384_v23 = vrot.slane %v383_v22, 1  ;;  %v421_v24 = vadd.f32 %v420_v21, %v419_v20 }
 0x105   :  { %v385_v25 = vadd.f32 %v384_v23, %v383_v22  ;;  %v422_v26 = vrot.slane %v421_v24, 1 }
 0x107   :  { %386 = vst [vmem:[%s664_s3] sm:$0x1] %v385_v25  ;;  %v423_v27 = vadd.f32 %v422_v26, %v421_v24 }
 0x109   :  { %424 = vst [vmem:[%s665_s4] sm:$0x1] %v423_v27 }

// kernel: resnet_block_pallas.9
= control target key start
LH: loop header
LB: loop body
LE: loop exit
PB: predicated region body
PF: predicated region fallthrough
CT: control target
= control target key end

     0   :  { %v65_v6 = vlaneseq  ;;  %s402_s1 = inlined_call_operand.vmem [shape: f32[1,128], index: 1, kind: input, shape index: {}]   ;;  %s403_s2 = inlined_call_operand.vmem [shape: f32[1,128], index: 2, kind: input, shape index: {}]   ;;  %s404_s0 = inlined_call_operand.vmem [shape: bf16[128,128], index: 0, kind: input, shape index: {}]   ;;  %s405_s3 = inlined_call_operand.vmem [shape: f32[1,128], index: 3, kind: input, shape index: {}]   ;;  %s406_s4 = inlined_call_operand.vmem [shape: f32[1,128], index: 4, kind: input, shape index: {}]   ;;  %s407_s5 = inlined_call_operand.vmem [shape: bf16[128,128], index: 5, kind: output, shape index: {}]  }
   0x1   :  { %v20_v0 = vld [vmem:[%s402_s1] sm:$0x1]  ;;  %v296_v9 = vld [vmem:[%s404_s0 + $0x8] sm:$0xff]   ;;  %v297_v11 = vld [vmem:[%s404_s0 + $0x10] sm:$0xff]  }
   0x2   :  { %v21_v1 = vld [vmem:[%s403_s2] sm:$0x1]  ;;  %v22_v2 = vmul.f32 %v20_v0, %v20_v0  ;;  %v66_v7 = vshrl.u32 %v65_v6, 7  ;;  %v298_v13 = vld [vmem:[%s404_s0 + $0x18] sm:$0xff]   ;;  %v230_v18 = vunpack.c.l.bf16 %v296_v9  ;;  %v300_v19 = vld [vmem:[%s404_s0 + $0x28] sm:$0xff]   ;;  %v231_v21 = vunpack.c.h.bf16 %v296_v9 }
   0x3   :  { %v225_v8 = vld [vmem:[%s404_s0] sm:$0xff]   ;;  %v234_v22 = vunpack.c.l.bf16 %v297_v11  ;;  %v235_v23 = vunpack.c.h.bf16 %v297_v11  ;;  %v301_v24 = vld [vmem:[%s404_s0 + $0x30] sm:$0xff]   ;;  %v302_v25 = vld [vmem:[%s404_s0 + $0x38] sm:$0xff]   ;;  %v238_v27 = vunpack.c.l.bf16 %v298_v13  ;;  %v239_v28 = vunpack.c.h.bf16 %v298_v13 }
   0x4   :  { %v23_v3 = vsub.f32 %v21_v1, %v22_v2  ;;  %v25_v10 = vld [vmem:[%s405_s3] sm:$0x1]  ;;  %v67_v12 = vsub.s32 0, %v66_v7  ;;  %v226_v16 = vunpack.c.l.bf16 %v225_v8  ;;  %v227_v17 = vunpack.c.h.bf16 %v225_v8 }
   0x5   :  { %v299_v14 = vld [vmem:[%s404_s0 + $0x20] sm:$0xff]   ;;  %v246_v33 = vunpack.c.l.bf16 %v300_v19  ;;  %v247_v34 = vunpack.c.h.bf16 %v300_v19  ;;  %v250_v35 = vunpack.c.l.bf16 %v301_v24  ;;  %v251_v36 = vunpack.c.h.bf16 %v301_v24 }
   0x6   :  { %v24_v4 = vmax.f32 %v23_v3, 0.0  ;;  %v29_v26 = vld [vmem:[%s406_s4] sm:$0x1]  ;;  %v242_v29 = vunpack.c.l.bf16 %v299_v14  ;;  %v243_v30 = vunpack.c.h.bf16 %v299_v14  ;;  %v254_v37 = vunpack.c.l.bf16 %v302_v25 }
   0x7   :  { %v255_v38 = vunpack.c.h.bf16 %v302_v25 }
   0x8   :  { %v26_v5 = vadd.f32 1e-05, %v24_v4 }
   0xa   :  { %310 = vrsqrt.f32 %v26_v5 }
  0x14   :  { %v311_v15 = vpop.eup %310 }
  0x15   :  { %v28_v20 = vmul.f32 %v311_v15, %v25_v10 }
  0x17   :  { %v30_v31 = vmul.f32 %v28_v20, %v20_v0  ;;  %v68_v32 = vrot.slane %v28_v20, %v67_v12 }
  0x19   :  { %v31_v39 = vsub.f32 %v29_v26, %v30_v31  ;;  %v70_v40 = vmul.f32 %v226_v16, %v68_v32  ;;  %v71_v41 = vmul.f32 %v227_v17, %v68_v32  ;;  %v72_v42 = vmul.f32 %v230_v18, %v68_v32 }
  0x1a   :  { %v73_v43 = vmul.f32 %v231_v21, %v68_v32  ;;  %v74_v44 = vmul.f32 %v234_v22, %v68_v32  ;;  %v75_v45 = vmul.f32 %v235_v23, %v68_v32  ;;  %v76_v46 = vmul.f32 %v238_v27, %v68_v32 }
  0x1b   :  { %v90_v47 = vrot.slane %v31_v39, %v67_v12  ;;  %v77_v48 = vmul.f32 %v239_v28, %v68_v32  ;;  %v78_v49 = vmul.f32 %v242_v29, %v68_v32  ;;  %v79_v50 = vmul.f32 %v243_v30, %v68_v32 }
  0x1c   :  { %v80_v51 = vmul.f32 %v246_v33, %v68_v32  ;;  %v81_v52 = vmul.f32 %v247_v34, %v68_v32  ;;  %v82_v53 = vmul.f32 %v250_v35, %v68_v32  ;;  %v83_v54 = vmul.f32 %v251_v36, %v68_v32 }
  0x1d   :  { %v92_v55 = vadd.f32 %v90_v47, %v70_v40  ;;  %v93_v56 = vadd.f32 %v90_v47, %v71_v41  ;;  %v94_v57 = vadd.f32 %v90_v47, %v72_v42  ;;  %v95_v58 = vadd.f32 %v90_v47, %v73_v43 }
  0x1e   :  { %v96_v59 = vadd.f32 %v90_v47, %v74_v44  ;;  %v97_v60 = vadd.f32 %v90_v47, %v75_v45  ;;  %v98_v61 = vadd.f32 %v90_v47, %v76_v46  ;;  %v99_v62 = vadd.f32 %v90_v47, %v77_v48 }
  0x1f   :  { %v259_v63 = vpack.c.bf16 %v93_v56, %v92_v55  ;;  %v264_v0 = vpack.c.bf16 %v95_v58, %v94_v57  ;;  %v100_v1 = vadd.f32 %v90_v47, %v78_v49  ;;  %v101_v2 = vadd.f32 %v90_v47, %v79_v50 }
  0x20   :  { %v269_v3 = vpack.c.bf16 %v97_v60, %v96_v59  ;;  %v274_v4 = vpack.c.bf16 %v99_v62, %v98_v61  ;;  %v102_v5 = vadd.f32 %v90_v47, %v80_v51  ;;  %v103_v6 = vadd.f32 %v90_v47, %v81_v52 }
  0x21   :  { %260 = vst [vmem:[%s407_s5] sm:$0xff] %v259_v63   ;;  %303 = vst [vmem:[%s407_s5 + $0x8] sm:$0xff] %v264_v0   ;;  %v279_v7 = vpack.c.bf16 %v101_v2, %v100_v1  ;;  %v104_v8 = vadd.f32 %v90_v47, %v82_v53  ;;  %v105_v9 = vadd.f32 %v90_v47, %v83_v54 }
  0x22   :  { %v84_v10 = vmul.f32 %v254_v37, %v68_v32  ;;  %304 = vst [vmem:[%s407_s5 + $0x10] sm:$0xff] %v269_v3   ;;  %305 = vst [vmem:[%s407_s5 + $0x18] sm:$0xff] %v274_v4   ;;  %v284_v11 = vpack.c.bf16 %v103_v6, %v102_v5  ;;  %v85_v12 = vmul.f32 %v255_v38, %v68_v32 }
  0x23   :  { %306 = vst [vmem:[%s407_s5 + $0x20] sm:$0xff] %v279_v7   ;;  %v289_v13 = vpack.c.bf16 %v105_v9, %v104_v8 }
  0x24   :  { %v106_v14 = vadd.f32 %v90_v47, %v84_v10  ;;  %307 = vst [vmem:[%s407_s5 + $0x28] sm:$0xff] %v284_v11   ;;  %v107_v15 = vadd.f32 %v90_v47, %v85_v12 }
  0x25   :  { %308 = vst [vmem:[%s407_s5 + $0x30] sm:$0xff] %v289_v13  }
  0x26   :  { %v294_v16 = vpack.c.bf16 %v107_v15, %v106_v14 }
  0x28   :  { %309 = vst [vmem:[%s407_s5 + $0x38] sm:$0xff] %v294_v16  }

</bundles_post_ra>
